<compile_context>
chip_gen: v6e
topology: v6e:2x2x1
jax: 0.10.0
libtpu: 0.0.40
codegen_flags: <defaults>
</compile_context>

<pallas_src>
import math

import jax
import jax.numpy as jnp
import numpy as np
from jax.experimental import pallas as pl
from jax.experimental.pallas import tpu as pltpu

_SQRT2_INV = 1.0 / math.sqrt(2.0)
_BN_EPS = 1e-5


def _gelu_exact(x):
    # PyTorch nn.GELU() default = exact (erf) GELU.
    return 0.5 * x * (1.0 + jax.lax.erf(x * _SQRT2_INV))


def _tpu_budgets():
    """Per-generation scoped-VMEM budget and row-tile cap.

    128 MiB physical VMEM (v5e/v6e) -> 64 MiB scoped / TR<=1024;
    64 MiB physical (v7x)           -> 32 MiB scoped / TR<=512.
    Conservative (v7x-sized) defaults if the query is unavailable.
    """
    phys = 64 * 1024 * 1024
    try:
        if hasattr(pltpu, "get_tpu_info"):
            info = pltpu.get_tpu_info()
            for name in ("vmem_capacity_bytes", "vmem_size_bytes", "vmem_bytes"):
                v = getattr(info, name, None)
                if isinstance(v, int) and v > 0:
                    phys = v
                    break
    except Exception:
        pass
    vmem_limit = int(min(max(phys // 2, 16 * 1024 * 1024), 64 * 1024 * 1024))
    row_cap = 1024 if phys >= 96 * 1024 * 1024 else 512
    return vmem_limit, row_cap


def _pick_row_tile(hw, cap):
    """Largest multiple-of-128 divisor of hw that is <= cap."""
    best = None
    t = 128
    while t <= min(hw, cap):
        if hw % t == 0:
            best = t
        t += 128
    if best is not None:
        return best
    # TODO(synk): for HW with no multiple-of-128 divisor, a cdiv grid with a masked tail
    # tile would bound VMEM; fall back to whole-HW tiles (lane-dense but unbounded).
    return hw


# ----------------------------- Pallas kernels ------------------------------ #

def _make_depthwise_gelu_kernel(H, W, K, pad, padw):
    """Depthwise KxK conv (stride 1, 'same') + bias + exact GELU per image, plus
    per-channel sum / sum-of-squares (BN1 batch statistics) as extra outputs.

    Padding is done inside a VMEM scratch.  Only the halo strips are zeroed (the
    interior is fully overwritten).  The unaligned-sublane W shifts are hoisted out of
    the tap loop: K shifted copies instead of K*K.
    """
    Wp = W + 2 * padw
    col0 = padw - pad

    def kernel(x_ref, w_ref, b_ref, y_ref, ssum_ref, ssq_ref, xp_ref):
        C = x_ref.shape[-1]

        # Zero ONLY the halo strips; the interior is fully overwritten below.
        if pad > 0:
            zrow = jnp.zeros((pad, Wp, C), jnp.float32)
            zcol = jnp.zeros((H, padw, C), jnp.float32)
            xp_ref[0:pad, :, :] = zrow
            xp_ref[pad + H:, :, :] = zrow
            xp_ref[pad:pad + H, 0:padw, :] = zcol
            xp_ref[pad:pad + H, padw + W:, :] = zcol

        # Interior store at a sublane-aligned column offset (padw % 8 == 0).
        xp_ref[pad:pad + H, padw:padw + W, :] = x_ref[0].astype(jnp.float32)

        w = w_ref[...]            # (K*K, C) f32, hoisted
        b = b_ref[...]            # (1, C)   f32

        # Hoist the expensive (unaligned-sublane) W shifts out of the tap loop.
        # TODO(synk): pltpu.roll along the sublane axis + a strip-tiled (fori_loop,
        # unroll=True) accumulator would keep the taps in vregs / on the idle XLU slot;
        # also row-tile this stage with halo DMAs for very large H*W*C (v7x VMEM).
        xs = [xp_ref[:, col0 + dw: col0 + dw + W, :] for dw in range(K)]

        acc = jnp.zeros((H, W, C), jnp.float32)
        for dh in range(K):
            for dw in range(K):
                tap = dh * K + dw
                acc = acc + xs[dw][dh:dh + H] * w[tap:tap + 1, :]

        g = _gelu_exact(acc + b)                                   # (H, W, C) f32
        y_ref[0] = g.astype(jnp.bfloat16)                          # bf16 to HBM

        # BN1 batch statistics from the f32 values (before the bf16 cast).
        ssum_ref[0] = jnp.sum(jnp.sum(g, axis=0), axis=0, keepdims=True)       # (1, C)
        ssq_ref[0] = jnp.sum(jnp.sum(g * g, axis=0), axis=0, keepdims=True)    # (1, C)

    return kernel


def _residual_pointwise_chfirst_kernel(y1_ref, x_ref, s1_ref, t1_ref, w_ref, b_ref,
                                       y2_ref, ssum_ref, ssq_ref):
    """BN1 apply (precomputed scale/shift) + residual + 1x1 conv + bias + GELU.

    The matmul contracts the Cin axes of (Cout,Cin) x (TR,Cin) on the MXU in bf16, so
    the output tile is already channels-first (Cout, TR) -- lane-dense for any Cout and
    no transpose is ever needed.  BN2 partial statistics are written once per (n, r)
    tile, keeping both grid axes 'parallel'.
    """
    z = (y1_ref[0].astype(jnp.float32) * s1_ref[...] + t1_ref[...]
         + x_ref[0].astype(jnp.float32))                            # (TR, Cin) f32
    out = jax.lax.dot_general(
        w_ref[...], z.astype(jnp.bfloat16),                         # bf16 x bf16 on MXU
        (((1,), (1,)), ((), ())),                                   # contract Cin axes
        preferred_element_type=jnp.float32)                         # (Cout, TR) f32
    out = _gelu_exact(out + b_ref[...])                             # bias (Cout, 1)
    y2_ref[0] = out.astype(jnp.bfloat16)                            # bf16, lane-dense

    # Per-tile BN2 partials from the f32 values (lane-axis reduce -> (Cout, 1)).
    ssum_ref[0, 0] = jnp.sum(out, axis=1, keepdims=True)
    ssq_ref[0, 0] = jnp.sum(out * out, axis=1, keepdims=True)


def _bn2_affine_kernel(y2_ref, s_ref, t_ref, o_ref):
    """BN2 elementwise affine on channels-first, lane-dense (Cout, TR) tiles."""
    o_ref[0] = y2_ref[0].astype(jnp.float32) * s_ref[...] + t_ref[...]


# ------------------------------- Wrapper ----------------------------------- #

def conv_mixer_forward(x_nchw, params, kernel_size=3, row_tile=None):
    N, Cin, H, W = x_nchw.shape
    K = kernel_size
    p = K // 2
    Cout = params["pw_w"].shape[1]
    HW = H * W

    vmem_limit, row_cap = _tpu_budgets()
    TR = row_tile if row_tile is not None else _pick_row_tile(HW, row_cap)
    assert HW % TR == 0, "row_tile must divide H*W"
    R = HW // TR
    PADW = max(8, ((p + 7) // 8) * 8)        # sublane-aligned halo column offset

    # Single bf16 NHWC copy of x, used by stage 1 and as the stage-2 residual.
    # TODO(synk): fold this transpose into stage 1 (read NCHW blocks + in-VMEM relayout)
    # to drop one XLA pass over the input tensor.
    x_nhwc = jnp.transpose(x_nchw, (0, 2, 3, 1)).astype(jnp.bfloat16)

    dw_w = params["dw_w"].reshape(K * K, Cin).astype(jnp.float32)
    dw_b = params["dw_b"].reshape(1, Cin).astype(jnp.float32)

    # ---- Stage 1: depthwise conv + GELU (bf16 out) + fused BN1 statistics ----
    y1, sum1, ssq1 = pl.pallas_call(
        _make_depthwise_gelu_kernel(H, W, K, p, PADW),
        out_shape=(jax.ShapeDtypeStruct((N, H, W, Cin), jnp.bfloat16),
                   jax.ShapeDtypeStruct((N, 1, Cin), jnp.float32),
                   jax.ShapeDtypeStruct((N, 1, Cin), jnp.float32)),
        grid=(N,),
        in_specs=[
            pl.BlockSpec((1, H, W, Cin), lambda n: (n, 0, 0, 0)),
            pl.BlockSpec((K * K, Cin), lambda n: (0, 0)),
            pl.BlockSpec((1, Cin), lambda n: (0, 0)),
        ],
        out_specs=(
            pl.BlockSpec((1, H, W, Cin), lambda n: (n, 0, 0, 0)),
            pl.BlockSpec((1, 1, Cin), lambda n: (n, 0, 0)),
            pl.BlockSpec((1, 1, Cin), lambda n: (n, 0, 0)),
        ),
        scratch_shapes=[pltpu.VMEM((H + 2 * p, W + 2 * PADW, Cin), jnp.float32)],
        compiler_params=pltpu.CompilerParams(
            dimension_semantics=("parallel",),
            vmem_limit_bytes=vmem_limit),
    )(x_nhwc, dw_w, dw_b)

    # Tiny (C,)-sized BN1 finalization in plain JAX.
    cnt = float(N * H * W)
    mean1 = jnp.sum(sum1, axis=(0, 1)) / cnt                              # (Cin,)
    var1 = jnp.maximum(jnp.sum(ssq1, axis=(0, 1)) / cnt - mean1 * mean1, 0.0)
    scale1 = params["bn1_gamma"] * jax.lax.rsqrt(var1 + _BN_EPS)
    s1 = scale1.reshape(1, Cin)
    t1 = (params["bn1_beta"] - mean1 * scale1).reshape(1, Cin)

    # ---- Stage 2: BN1 apply + residual + 1x1 conv (bf16 MXU, channels-first out) ----
    y1f = y1.reshape(N, HW, Cin)           # free: contiguous merges, done in wrapper
    xf = x_nhwc.reshape(N, HW, Cin)
    pw_wt = jnp.transpose(params["pw_w"], (1, 0)).astype(jnp.bfloat16)    # (Cout, Cin)
    pw_b = params["pw_b"].reshape(Cout, 1).astype(jnp.float32)

    y2cf, sum2, ssq2 = pl.pallas_call(
        _residual_pointwise_chfirst_kernel,
        out_shape=(jax.ShapeDtypeStruct((N, Cout, HW), jnp.bfloat16),
                   jax.ShapeDtypeStruct((N, R, Cout, 1), jnp.float32),
                   jax.ShapeDtypeStruct((N, R, Cout, 1), jnp.float32)),
        grid=(N, R),
        in_specs=[
            pl.BlockSpec((1, TR, Cin), lambda n, r: (n, r, 0)),
            pl.BlockSpec((1, TR, Cin), lambda n, r: (n, r, 0)),
            pl.BlockSpec((1, Cin), lambda n, r: (0, 0)),
            pl.BlockSpec((1, Cin), lambda n, r: (0, 0)),
            pl.BlockSpec((Cout, Cin), lambda n, r: (0, 0)),
            pl.BlockSpec((Cout, 1), lambda n, r: (0, 0)),
        ],
        out_specs=(
            pl.BlockSpec((1, Cout, TR), lambda n, r: (n, 0, r)),
            pl.BlockSpec((1, 1, Cout, 1), lambda n, r: (n, r, 0, 0)),
            pl.BlockSpec((1, 1, Cout, 1), lambda n, r: (n, r, 0, 0)),
        ),
        compiler_params=pltpu.CompilerParams(
            dimension_semantics=("parallel", "parallel"),   # per-tile partial stats
            vmem_limit_bytes=vmem_limit),
    )(y1f, xf, s1, t1, pw_wt, pw_b)

    mean2 = jnp.sum(sum2, axis=(0, 1, 3)) / cnt                           # (Cout,)
    var2 = jnp.maximum(jnp.sum(ssq2, axis=(0, 1, 3)) / cnt - mean2 * mean2, 0.0)
    scale2 = params["bn2_gamma"] * jax.lax.rsqrt(var2 + _BN_EPS)
    s2 = scale2.reshape(Cout, 1)
    t2 = (params["bn2_beta"] - mean2 * scale2).reshape(Cout, 1)

    # ---- Stage 3: BN2 affine on channels-first, lane-dense tiles (f32 out) ----
    out_cf = pl.pallas_call(
        _bn2_affine_kernel,
        out_shape=jax.ShapeDtypeStruct((N, Cout, HW), jnp.float32),
        grid=(N, R),
        in_specs=[
            pl.BlockSpec((1, Cout, TR), lambda n, r: (n, 0, r)),
            pl.BlockSpec((Cout, 1), lambda n, r: (0, 0)),
            pl.BlockSpec((Cout, 1), lambda n, r: (0, 0)),
        ],
        out_specs=pl.BlockSpec((1, Cout, TR), lambda n, r: (n, 0, r)),
        compiler_params=pltpu.CompilerParams(
            dimension_semantics=("parallel", "parallel"),
            vmem_limit_bytes=vmem_limit),
    )(y2cf, s2, t2)

    return out_cf.reshape(N, Cout, H, W)     # free: contiguous split, NCHW out


# ---------------------- Deterministic parameter init ----------------------- #

def init_params(key, in_ch, out_ch, K=3):
    k1, k2, k3, k4 = jax.random.split(key, 4)
    s_dw = 1.0 / math.sqrt(K * K)                       # depthwise fan_in = 1*K*K
    s_pw = 1.0 / math.sqrt(in_ch)                       # pointwise fan_in = in_ch*1*1
    return dict(
        dw_w=jax.random.uniform(k1, (K, K, in_ch), jnp.float32, -s_dw, s_dw),
        dw_b=jax.random.uniform(k2, (in_ch,), jnp.float32, -s_dw, s_dw),
        pw_w=jax.random.uniform(k3, (in_ch, out_ch), jnp.float32, -s_pw, s_pw),
        pw_b=jax.random.uniform(k4, (out_ch,), jnp.float32, -s_pw, s_pw),
        bn1_gamma=jnp.ones((in_ch,), jnp.float32),
        bn1_beta=jnp.zeros((in_ch,), jnp.float32),
        bn2_gamma=jnp.ones((out_ch,), jnp.float32),
        bn2_beta=jnp.zeros((out_ch,), jnp.float32),
    )


# --------------------------- Pure-JAX reference ----------------------------- #

def reference_forward(x_nchw, params, K=3):
    Cin = x_nchw.shape[1]
    p = K // 2
    # depthwise conv (groups = Cin), cross-correlation like PyTorch
    w_dw = jnp.transpose(params["dw_w"], (2, 0, 1))[:, None, :, :]   # (Cin,1,K,K) OIHW
    y = jax.lax.conv_general_dilated(
        x_nchw, w_dw, (1, 1), [(p, p), (p, p)],
        feature_group_count=Cin, dimension_numbers=("NCHW", "OIHW", "NCHW"))
    y = y + params["dw_b"][None, :, None, None]
    y = _gelu_exact(y)
    m = jnp.mean(y, axis=(0, 2, 3), keepdims=True)
    v = jnp.mean(jnp.square(y - m), axis=(0, 2, 3), keepdims=True)
    y = (y - m) / jnp.sqrt(v + _BN_EPS) * params["bn1_gamma"][None, :, None, None] \
        + params["bn1_beta"][None, :, None, None]
    y = y + x_nchw
    w_pw = jnp.transpose(params["pw_w"], (1, 0))[:, :, None, None]   # (Cout,Cin,1,1)
    z = jax.lax.conv_general_dilated(
        y, w_pw, (1, 1), [(0, 0), (0, 0)],
        dimension_numbers=("NCHW", "OIHW", "NCHW"))
    z = z + params["pw_b"][None, :, None, None]
    z = _gelu_exact(z)
    m2 = jnp.mean(z, axis=(0, 2, 3), keepdims=True)
    v2 = jnp.mean(jnp.square(z - m2), axis=(0, 2, 3), keepdims=True)
    z = (z - m2) / jnp.sqrt(v2 + _BN_EPS) * params["bn2_gamma"][None, :, None, None] \
        + params["bn2_beta"][None, :, None, None]
    return z


if __name__ == "__main__":
    key = jax.random.PRNGKey(0)
    kx, kp = jax.random.split(key)

    N, Cin, H, W = 2, 4, 16, 16
    Cout, K = 8, 3

    x = jax.random.normal(kx, (N, Cin, H, W), jnp.float32)
    params = init_params(kp, Cin, Cout, K)

    # row_tile=128 -> 2 row tiles per image, exercising the per-tile BN2 partials.
    fwd = jax.jit(conv_mixer_forward, static_argnames=("kernel_size", "row_tile"))
    out = fwd(x, params, kernel_size=K, row_tile=128)
    out = jax.block_until_ready(out)

    ref = reference_forward(x, params, K)
    # Tolerance covers the deliberate bf16 HBM storage of x/y1/y2 and the bf16 MXU
    # matmul operands (|rel. rounding| ~ 2^-9 each) vs the all-f32 reference.
    np.testing.assert_allclose(np.asarray(out), np.asarray(ref), rtol=4e-2, atol=4e-2)

    print("KERNEL_OK")
</pallas_src>

<mosaic_0001>
module attributes {stable_mosaic.version = 11 : i64} {
  func.func @kernel(%arg0: i32, %arg1: memref<1x16x16x4xbf16, #tpu.memory_space<vmem>>, %arg2: memref<9x4xf32, #tpu.memory_space<vmem>>, %arg3: memref<1x4xf32, #tpu.memory_space<vmem>>, %arg4: memref<1x16x16x4xbf16, #tpu.memory_space<vmem>>, %arg5: memref<1x1x4xf32, #tpu.memory_space<vmem>>, %arg6: memref<1x1x4xf32, #tpu.memory_space<vmem>>, %arg7: memref<18x32x4xf32, #tpu.memory_space<vmem>>) attributes {dimension_semantics = [#tpu.dimension_semantics<parallel>], iteration_bounds = array<i64: 2>, scalar_prefetch = 0 : i64, scratch_operands = 1 : i64, tpu.core_type = #tpu.core_type<tc>, window_params = [{transform_indices = @transform_0, window_bounds = array<i64: 1, 16, 16, 4>}, {pipeline_mode = #tpu.pipeline_mode<synchronous>, transform_indices = @transform_1, window_bounds = array<i64: 9, 4>}, {pipeline_mode = #tpu.pipeline_mode<synchronous>, transform_indices = @transform_2, window_bounds = array<i64: 1, 4>}, {transform_indices = @transform_3, window_bounds = array<i64: 1, 16, 16, 4>}, {transform_indices = @transform_4, window_bounds = array<i64: 1, 1, 4>}, {transform_indices = @transform_5, window_bounds = array<i64: 1, 1, 4>}]} {
    %cst = arith.constant 0.000000e+00 : f32
    %0 = vector.broadcast %cst : f32 to vector<1x32x4xf32>
    %cst_0 = arith.constant 0.000000e+00 : f32
    %1 = vector.broadcast %cst_0 : f32 to vector<16x8x4xf32>
    %c0 = arith.constant 0 : index
    %c0_1 = arith.constant 0 : index
    %c0_2 = arith.constant 0 : index
    %2 = vector.load %arg7[%c0, %c0_1, %c0_2] : memref<18x32x4xf32, #tpu.memory_space<vmem>>, vector<1x32x4xf32>
    tpu.vector_store %arg7[%c0, %c0_1, %c0_2], %0 {strides = array<i32>} : memref<18x32x4xf32, #tpu.memory_space<vmem>>, vector<1x32x4xf32>,
    %c17 = arith.constant 17 : index
    %c0_3 = arith.constant 0 : index
    %c0_4 = arith.constant 0 : index
    %3 = vector.load %arg7[%c17, %c0_3, %c0_4] : memref<18x32x4xf32, #tpu.memory_space<vmem>>, vector<1x32x4xf32>
    tpu.vector_store %arg7[%c17, %c0_3, %c0_4], %0 {strides = array<i32>} : memref<18x32x4xf32, #tpu.memory_space<vmem>>, vector<1x32x4xf32>,
    %c1 = arith.constant 1 : index
    %c0_5 = arith.constant 0 : index
    %c0_6 = arith.constant 0 : index
    %4 = vector.load %arg7[%c1, %c0_5, %c0_6] : memref<18x32x4xf32, #tpu.memory_space<vmem>>, vector<16x8x4xf32>
    tpu.vector_store %arg7[%c1, %c0_5, %c0_6], %1 {strides = array<i32>} : memref<18x32x4xf32, #tpu.memory_space<vmem>>, vector<16x8x4xf32>,
    %c1_7 = arith.constant 1 : index
    %c24 = arith.constant 24 : index
    %c0_8 = arith.constant 0 : index
    %5 = vector.load %arg7[%c1_7, %c24, %c0_8] : memref<18x32x4xf32, #tpu.memory_space<vmem>>, vector<16x8x4xf32>
    tpu.vector_store %arg7[%c1_7, %c24, %c0_8], %1 {strides = array<i32>} : memref<18x32x4xf32, #tpu.memory_space<vmem>>, vector<16x8x4xf32>,
    %c0_9 = arith.constant 0 : index
    %c0_10 = arith.constant 0 : index
    %c0_11 = arith.constant 0 : index
    %c0_12 = arith.constant 0 : index
    %6 = vector.load %arg1[%c0_9, %c0_10, %c0_11, %c0_12] : memref<1x16x16x4xbf16, #tpu.memory_space<vmem>>, vector<1x16x16x4xbf16>
    %7 = vector.shape_cast %6 : vector<1x16x16x4xbf16> to vector<16x16x4xbf16>
    %8 = arith.extf %7 : vector<16x16x4xbf16> to vector<16x16x4xf32>
    %c1_13 = arith.constant 1 : index
    %c8 = arith.constant 8 : index
    %c0_14 = arith.constant 0 : index
    %9 = vector.load %arg7[%c1_13, %c8, %c0_14] : memref<18x32x4xf32, #tpu.memory_space<vmem>>, vector<16x16x4xf32>
    tpu.vector_store %arg7[%c1_13, %c8, %c0_14], %8 {strides = array<i32>} : memref<18x32x4xf32, #tpu.memory_space<vmem>>, vector<16x16x4xf32>,
    %c0_15 = arith.constant 0 : index
    %c0_16 = arith.constant 0 : index
    %10 = vector.load %arg2[%c0_15, %c0_16] : memref<9x4xf32, #tpu.memory_space<vmem>>, vector<9x4xf32>
    %c0_17 = arith.constant 0 : index
    %c0_18 = arith.constant 0 : index
    %11 = vector.load %arg3[%c0_17, %c0_18] : memref<1x4xf32, #tpu.memory_space<vmem>>, vector<1x4xf32>
    %c0_19 = arith.constant 0 : index
    %c7 = arith.constant 7 : index
    %c0_20 = arith.constant 0 : index
    %12 = vector.load %arg7[%c0_19, %c7, %c0_20] : memref<18x32x4xf32, #tpu.memory_space<vmem>>, vector<18x16x4xf32>
    %c0_21 = arith.constant 0 : index
    %c8_22 = arith.constant 8 : index
    %c0_23 = arith.constant 0 : index
    %13 = vector.load %arg7[%c0_21, %c8_22, %c0_23] : memref<18x32x4xf32, #tpu.memory_space<vmem>>, vector<18x16x4xf32>
    %c0_24 = arith.constant 0 : index
    %c9 = arith.constant 9 : index
    %c0_25 = arith.constant 0 : index
    %14 = vector.load %arg7[%c0_24, %c9, %c0_25] : memref<18x32x4xf32, #tpu.memory_space<vmem>>, vector<18x16x4xf32>
    %cst_26 = arith.constant 0.000000e+00 : f32
    %15 = vector.broadcast %cst_26 : f32 to vector<16x16x4xf32>
    %16 = vector.extract_strided_slice %12 {offsets = [0, 0, 0], sizes = [16, 16, 4], strides = [1, 1, 1]} : vector<18x16x4xf32> to vector<16x16x4xf32>
    %17 = vector.extract_strided_slice %10 {offsets = [0, 0], sizes = [1, 4], strides = [1, 1]} : vector<9x4xf32> to vector<1x4xf32>
    %18 = vector.shape_cast %17 : vector<1x4xf32> to vector<1x1x4xf32>
    %19 = vector.broadcast %18 : vector<1x1x4xf32> to vector<16x16x4xf32>
    %20 = arith.mulf %16, %19 : vector<16x16x4xf32>
    %21 = arith.addf %15, %20 : vector<16x16x4xf32>
    %22 = vector.extract_strided_slice %13 {offsets = [0, 0, 0], sizes = [16, 16, 4], strides = [1, 1, 1]} : vector<18x16x4xf32> to vector<16x16x4xf32>
    %23 = vector.extract_strided_slice %10 {offsets = [1, 0], sizes = [1, 4], strides = [1, 1]} : vector<9x4xf32> to vector<1x4xf32>
    %24 = vector.shape_cast %23 : vector<1x4xf32> to vector<1x1x4xf32>
    %25 = vector.broadcast %24 : vector<1x1x4xf32> to vector<16x16x4xf32>
    %26 = arith.mulf %22, %25 : vector<16x16x4xf32>
    %27 = arith.addf %21, %26 : vector<16x16x4xf32>
    %28 = vector.extract_strided_slice %14 {offsets = [0, 0, 0], sizes = [16, 16, 4], strides = [1, 1, 1]} : vector<18x16x4xf32> to vector<16x16x4xf32>
    %29 = vector.extract_strided_slice %10 {offsets = [2, 0], sizes = [1, 4], strides = [1, 1]} : vector<9x4xf32> to vector<1x4xf32>
    %30 = vector.shape_cast %29 : vector<1x4xf32> to vector<1x1x4xf32>
    %31 = vector.broadcast %30 : vector<1x1x4xf32> to vector<16x16x4xf32>
    %32 = arith.mulf %28, %31 : vector<16x16x4xf32>
    %33 = arith.addf %27, %32 : vector<16x16x4xf32>
    %34 = vector.extract_strided_slice %12 {offsets = [1, 0, 0], sizes = [16, 16, 4], strides = [1, 1, 1]} : vector<18x16x4xf32> to vector<16x16x4xf32>
    %35 = vector.extract_strided_slice %10 {offsets = [3, 0], sizes = [1, 4], strides = [1, 1]} : vector<9x4xf32> to vector<1x4xf32>
    %36 = vector.shape_cast %35 : vector<1x4xf32> to vector<1x1x4xf32>
    %37 = vector.broadcast %36 : vector<1x1x4xf32> to vector<16x16x4xf32>
    %38 = arith.mulf %34, %37 : vector<16x16x4xf32>
    %39 = arith.addf %33, %38 : vector<16x16x4xf32>
    %40 = vector.extract_strided_slice %13 {offsets = [1, 0, 0], sizes = [16, 16, 4], strides = [1, 1, 1]} : vector<18x16x4xf32> to vector<16x16x4xf32>
    %41 = vector.extract_strided_slice %10 {offsets = [4, 0], sizes = [1, 4], strides = [1, 1]} : vector<9x4xf32> to vector<1x4xf32>
    %42 = vector.shape_cast %41 : vector<1x4xf32> to vector<1x1x4xf32>
    %43 = vector.broadcast %42 : vector<1x1x4xf32> to vector<16x16x4xf32>
    %44 = arith.mulf %40, %43 : vector<16x16x4xf32>
    %45 = arith.addf %39, %44 : vector<16x16x4xf32>
    %46 = vector.extract_strided_slice %14 {offsets = [1, 0, 0], sizes = [16, 16, 4], strides = [1, 1, 1]} : vector<18x16x4xf32> to vector<16x16x4xf32>
    %47 = vector.extract_strided_slice %10 {offsets = [5, 0], sizes = [1, 4], strides = [1, 1]} : vector<9x4xf32> to vector<1x4xf32>
    %48 = vector.shape_cast %47 : vector<1x4xf32> to vector<1x1x4xf32>
    %49 = vector.broadcast %48 : vector<1x1x4xf32> to vector<16x16x4xf32>
    %50 = arith.mulf %46, %49 : vector<16x16x4xf32>
    %51 = arith.addf %45, %50 : vector<16x16x4xf32>
    %52 = vector.extract_strided_slice %12 {offsets = [2, 0, 0], sizes = [16, 16, 4], strides = [1, 1, 1]} : vector<18x16x4xf32> to vector<16x16x4xf32>
    %53 = vector.extract_strided_slice %10 {offsets = [6, 0], sizes = [1, 4], strides = [1, 1]} : vector<9x4xf32> to vector<1x4xf32>
    %54 = vector.shape_cast %53 : vector<1x4xf32> to vector<1x1x4xf32>
    %55 = vector.broadcast %54 : vector<1x1x4xf32> to vector<16x16x4xf32>
    %56 = arith.mulf %52, %55 : vector<16x16x4xf32>
    %57 = arith.addf %51, %56 : vector<16x16x4xf32>
    %58 = vector.extract_strided_slice %13 {offsets = [2, 0, 0], sizes = [16, 16, 4], strides = [1, 1, 1]} : vector<18x16x4xf32> to vector<16x16x4xf32>
    %59 = vector.extract_strided_slice %10 {offsets = [7, 0], sizes = [1, 4], strides = [1, 1]} : vector<9x4xf32> to vector<1x4xf32>
    %60 = vector.shape_cast %59 : vector<1x4xf32> to vector<1x1x4xf32>
    %61 = vector.broadcast %60 : vector<1x1x4xf32> to vector<16x16x4xf32>
    %62 = arith.mulf %58, %61 : vector<16x16x4xf32>
    %63 = arith.addf %57, %62 : vector<16x16x4xf32>
    %64 = vector.extract_strided_slice %14 {offsets = [2, 0, 0], sizes = [16, 16, 4], strides = [1, 1, 1]} : vector<18x16x4xf32> to vector<16x16x4xf32>
    %65 = vector.extract_strided_slice %10 {offsets = [8, 0], sizes = [1, 4], strides = [1, 1]} : vector<9x4xf32> to vector<1x4xf32>
    %66 = vector.shape_cast %65 : vector<1x4xf32> to vector<1x1x4xf32>
    %67 = vector.broadcast %66 : vector<1x1x4xf32> to vector<16x16x4xf32>
    %68 = arith.mulf %64, %67 : vector<16x16x4xf32>
    %69 = arith.addf %63, %68 : vector<16x16x4xf32>
    %70 = vector.shape_cast %11 : vector<1x4xf32> to vector<1x1x4xf32>
    %71 = vector.broadcast %70 : vector<1x1x4xf32> to vector<16x16x4xf32>
    %72 = arith.addf %69, %71 : vector<16x16x4xf32>
    %cst_27 = arith.constant 5.000000e-01 : f32
    %73 = vector.broadcast %cst_27 : f32 to vector<16x16x4xf32>
    %74 = arith.mulf %73, %72 : vector<16x16x4xf32>
    %cst_28 = arith.constant 0.707106769 : f32
    %75 = vector.broadcast %cst_28 : f32 to vector<16x16x4xf32>
    %76 = arith.mulf %72, %75 : vector<16x16x4xf32>
    %77 = math.erf %76 : vector<16x16x4xf32>
    %cst_29 = arith.constant 1.000000e+00 : f32
    %78 = vector.broadcast %cst_29 : f32 to vector<16x16x4xf32>
    %79 = arith.addf %78, %77 : vector<16x16x4xf32>
    %80 = arith.mulf %74, %79 : vector<16x16x4xf32>
    %81 = arith.truncf %80 : vector<16x16x4xf32> to vector<16x16x4xbf16>
    %c0_30 = arith.constant 0 : index
    %c0_31 = arith.constant 0 : index
    %c0_32 = arith.constant 0 : index
    %c0_33 = arith.constant 0 : index
    %82 = vector.load %arg4[%c0_30, %c0_31, %c0_32, %c0_33] : memref<1x16x16x4xbf16, #tpu.memory_space<vmem>>, vector<1x16x16x4xbf16>
    %83 = vector.shape_cast %82 : vector<1x16x16x4xbf16> to vector<16x16x4xbf16>
    %84 = vector.shape_cast %81 : vector<16x16x4xbf16> to vector<1x16x16x4xbf16>
    tpu.vector_store %arg4[%c0_30, %c0_31, %c0_32, %c0_33], %84 {strides = array<i32>} : memref<1x16x16x4xbf16, #tpu.memory_space<vmem>>, vector<1x16x16x4xbf16>,
    %cst_34 = arith.constant dense<0.000000e+00> : vector<16x4xf32>
    %85 = vector.multi_reduction <add>, %80, %cst_34 [0] : vector<16x16x4xf32> to vector<16x4xf32>
    %cst_35 = arith.constant dense<0.000000e+00> : vector<4xf32>
    %86 = vector.multi_reduction <add>, %85, %cst_35 [0] : vector<16x4xf32> to vector<4xf32>
    %87 = vector.shape_cast %86 : vector<4xf32> to vector<1x4xf32>
    %c0_36 = arith.constant 0 : index
    %c0_37 = arith.constant 0 : index
    %c0_38 = arith.constant 0 : index
    %88 = vector.load %arg5[%c0_36, %c0_37, %c0_38] : memref<1x1x4xf32, #tpu.memory_space<vmem>>, vector<1x1x4xf32>
    %89 = vector.shape_cast %88 : vector<1x1x4xf32> to vector<1x4xf32>
    %90 = vector.shape_cast %87 : vector<1x4xf32> to vector<1x1x4xf32>
    tpu.vector_store %arg5[%c0_36, %c0_37, %c0_38], %90 {strides = array<i32>} : memref<1x1x4xf32, #tpu.memory_space<vmem>>, vector<1x1x4xf32>,
    %91 = arith.mulf %80, %80 : vector<16x16x4xf32>
    %cst_39 = arith.constant dense<0.000000e+00> : vector<16x4xf32>
    %92 = vector.multi_reduction <add>, %91, %cst_39 [0] : vector<16x16x4xf32> to vector<16x4xf32>
    %cst_40 = arith.constant dense<0.000000e+00> : vector<4xf32>
    %93 = vector.multi_reduction <add>, %92, %cst_40 [0] : vector<16x4xf32> to vector<4xf32>
    %94 = vector.shape_cast %93 : vector<4xf32> to vector<1x4xf32>
    %c0_41 = arith.constant 0 : index
    %c0_42 = arith.constant 0 : index
    %c0_43 = arith.constant 0 : index
    %95 = vector.load %arg6[%c0_41, %c0_42, %c0_43] : memref<1x1x4xf32, #tpu.memory_space<vmem>>, vector<1x1x4xf32>
    %96 = vector.shape_cast %95 : vector<1x1x4xf32> to vector<1x4xf32>
    %97 = vector.shape_cast %94 : vector<1x4xf32> to vector<1x1x4xf32>
    tpu.vector_store %arg6[%c0_41, %c0_42, %c0_43], %97 {strides = array<i32>} : memref<1x1x4xf32, #tpu.memory_space<vmem>>, vector<1x1x4xf32>,
    return
  }
  func.func @transform_0(%arg0: i32) -> (i32, i32, i32, i32) {
    %c0_i32 = arith.constant 0 : i32
    %c0_i32_0 = arith.constant 0 : i32
    %c0_i32_1 = arith.constant 0 : i32
    %c0_i32_2 = arith.constant 0 : i32
    return %arg0, %c0_i32, %c0_i32_0, %c0_i32_1 : i32, i32, i32, i32
  }
  func.func @transform_1(%arg0: i32) -> (i32, i32) {
    %c0_i32 = arith.constant 0 : i32
    %c0_i32_0 = arith.constant 0 : i32
    %c0_i32_1 = arith.constant 0 : i32
    return %c0_i32, %c0_i32_0 : i32, i32
  }
  func.func @transform_2(%arg0: i32) -> (i32, i32) {
    %c0_i32 = arith.constant 0 : i32
    %c0_i32_0 = arith.constant 0 : i32
    %c0_i32_1 = arith.constant 0 : i32
    return %c0_i32, %c0_i32_0 : i32, i32
  }
  func.func @transform_3(%arg0: i32) -> (i32, i32, i32, i32) {
    %c0_i32 = arith.constant 0 : i32
    %c0_i32_0 = arith.constant 0 : i32
    %c0_i32_1 = arith.constant 0 : i32
    %c0_i32_2 = arith.constant 0 : i32
    return %arg0, %c0_i32, %c0_i32_0, %c0_i32_1 : i32, i32, i32, i32
  }
  func.func @transform_4(%arg0: i32) -> (i32, i32, i32) {
    %c0_i32 = arith.constant 0 : i32
    %c0_i32_0 = arith.constant 0 : i32
    %c0_i32_1 = arith.constant 0 : i32
    return %arg0, %c0_i32, %c0_i32_0 : i32, i32, i32
  }
  func.func @transform_5(%arg0: i32) -> (i32, i32, i32) {
    %c0_i32 = arith.constant 0 : i32
    %c0_i32_0 = arith.constant 0 : i32
    %c0_i32_1 = arith.constant 0 : i32
    return %arg0, %c0_i32, %c0_i32_0 : i32, i32, i32
  }
}

module attributes {stable_mosaic.version = 11 : i64} {
  func.func @_residual_pointwise_chfirst_kernel(%arg0: i32, %arg1: i32, %arg2: memref<1x128x4xbf16, #tpu.memory_space<vmem>>, %arg3: memref<1x128x4xbf16, #tpu.memory_space<vmem>>, %arg4: memref<1x4xf32, #tpu.memory_space<vmem>>, %arg5: memref<1x4xf32, #tpu.memory_space<vmem>>, %arg6: memref<8x4xbf16, #tpu.memory_space<vmem>>, %arg7: memref<8x1xf32, #tpu.memory_space<vmem>>, %arg8: memref<1x8x128xbf16, #tpu.memory_space<vmem>>, %arg9: memref<1x1x8x1xf32, #tpu.memory_space<vmem>>, %arg10: memref<1x1x8x1xf32, #tpu.memory_space<vmem>>) attributes {dimension_semantics = [#tpu.dimension_semantics<parallel>, #tpu.dimension_semantics<parallel>], iteration_bounds = array<i64: 2, 2>, scalar_prefetch = 0 : i64, scratch_operands = 0 : i64, tpu.core_type = #tpu.core_type<tc>, window_params = [{transform_indices = @transform_0, window_bounds = array<i64: 1, 128, 4>}, {transform_indices = @transform_1, window_bounds = array<i64: 1, 128, 4>}, {pipeline_mode = #tpu.pipeline_mode<synchronous>, transform_indices = @transform_2, window_bounds = array<i64: 1, 4>}, {pipeline_mode = #tpu.pipeline_mode<synchronous>, transform_indices = @transform_3, window_bounds = array<i64: 1, 4>}, {pipeline_mode = #tpu.pipeline_mode<synchronous>, transform_indices = @transform_4, window_bounds = array<i64: 8, 4>}, {pipeline_mode = #tpu.pipeline_mode<synchronous>, transform_indices = @transform_5, window_bounds = array<i64: 8, 1>}, {transform_indices = @transform_6, window_bounds = array<i64: 1, 8, 128>}, {transform_indices = @transform_7, window_bounds = array<i64: 1, 1, 8, 1>}, {transform_indices = @transform_8, window_bounds = array<i64: 1, 1, 8, 1>}]} {
    %c0 = arith.constant 0 : index
    %c0_0 = arith.constant 0 : index
    %c0_1 = arith.constant 0 : index
    %0 = vector.load %arg2[%c0, %c0_0, %c0_1] : memref<1x128x4xbf16, #tpu.memory_space<vmem>>, vector<1x128x4xbf16>
    %1 = vector.shape_cast %0 : vector<1x128x4xbf16> to vector<128x4xbf16>
    %2 = arith.extf %1 : vector<128x4xbf16> to vector<128x4xf32>
    %c0_2 = arith.constant 0 : index
    %c0_3 = arith.constant 0 : index
    %3 = vector.load %arg4[%c0_2, %c0_3] : memref<1x4xf32, #tpu.memory_space<vmem>>, vector<1x4xf32>
    %4 = vector.broadcast %3 : vector<1x4xf32> to vector<128x4xf32>
    %5 = arith.mulf %2, %4 : vector<128x4xf32>
    %c0_4 = arith.constant 0 : index
    %c0_5 = arith.constant 0 : index
    %6 = vector.load %arg5[%c0_4, %c0_5] : memref<1x4xf32, #tpu.memory_space<vmem>>, vector<1x4xf32>
    %7 = vector.broadcast %6 : vector<1x4xf32> to vector<128x4xf32>
    %8 = arith.addf %5, %7 : vector<128x4xf32>
    %c0_6 = arith.constant 0 : index
    %c0_7 = arith.constant 0 : index
    %c0_8 = arith.constant 0 : index
    %9 = vector.load %arg3[%c0_6, %c0_7, %c0_8] : memref<1x128x4xbf16, #tpu.memory_space<vmem>>, vector<1x128x4xbf16>
    %10 = vector.shape_cast %9 : vector<1x128x4xbf16> to vector<128x4xbf16>
    %11 = arith.extf %10 : vector<128x4xbf16> to vector<128x4xf32>
    %12 = arith.addf %8, %11 : vector<128x4xf32>
    %c0_9 = arith.constant 0 : index
    %c0_10 = arith.constant 0 : index
    %13 = vector.load %arg6[%c0_9, %c0_10] : memref<8x4xbf16, #tpu.memory_space<vmem>>, vector<8x4xbf16>
    %14 = arith.truncf %12 : vector<128x4xf32> to vector<128x4xbf16>
    %cst = arith.constant dense<0.000000e+00> : vector<8x128xf32>
    %15 = tpu.matmul %13, %14, %cst {dimension_numbers = #tpu.dot_dimension_numbers<[1], [1], [0], [0], [0, 0, 1, 0], [], []>} : vector<8x4xbf16>, vector<128x4xbf16>, vector<8x128xf32> -> vector<8x128xf32>
    %c0_11 = arith.constant 0 : index
    %c0_12 = arith.constant 0 : index
    %16 = vector.load %arg7[%c0_11, %c0_12] : memref<8x1xf32, #tpu.memory_space<vmem>>, vector<8x1xf32>
    %17 = vector.broadcast %16 : vector<8x1xf32> to vector<8x128xf32>
    %18 = arith.addf %15, %17 : vector<8x128xf32>
    %cst_13 = arith.constant 5.000000e-01 : f32
    %19 = vector.broadcast %cst_13 : f32 to vector<8x128xf32>
    %20 = arith.mulf %19, %18 : vector<8x128xf32>
    %cst_14 = arith.constant 0.707106769 : f32
    %21 = vector.broadcast %cst_14 : f32 to vector<8x128xf32>
    %22 = arith.mulf %18, %21 : vector<8x128xf32>
    %23 = math.erf %22 : vector<8x128xf32>
    %cst_15 = arith.constant 1.000000e+00 : f32
    %24 = vector.broadcast %cst_15 : f32 to vector<8x128xf32>
    %25 = arith.addf %24, %23 : vector<8x128xf32>
    %26 = arith.mulf %20, %25 : vector<8x128xf32>
    %27 = arith.truncf %26 : vector<8x128xf32> to vector<8x128xbf16>
    %c0_16 = arith.constant 0 : index
    %c0_17 = arith.constant 0 : index
    %c0_18 = arith.constant 0 : index
    %28 = vector.load %arg8[%c0_16, %c0_17, %c0_18] : memref<1x8x128xbf16, #tpu.memory_space<vmem>>, vector<1x8x128xbf16>
    %29 = vector.shape_cast %28 : vector<1x8x128xbf16> to vector<8x128xbf16>
    %30 = vector.shape_cast %27 : vector<8x128xbf16> to vector<1x8x128xbf16>
    tpu.vector_store %arg8[%c0_16, %c0_17, %c0_18], %30 {strides = array<i32>} : memref<1x8x128xbf16, #tpu.memory_space<vmem>>, vector<1x8x128xbf16>,
    %cst_19 = arith.constant dense<0.000000e+00> : vector<8xf32>
    %31 = vector.multi_reduction <add>, %26, %cst_19 [1] : vector<8x128xf32> to vector<8xf32>
    %32 = vector.shape_cast %31 : vector<8xf32> to vector<8x1xf32>
    %c0_20 = arith.constant 0 : index
    %c0_21 = arith.constant 0 : index
    %c0_22 = arith.constant 0 : index
    %c0_23 = arith.constant 0 : index
    %33 = vector.load %arg9[%c0_20, %c0_21, %c0_22, %c0_23] : memref<1x1x8x1xf32, #tpu.memory_space<vmem>>, vector<1x1x8x1xf32>
    %34 = vector.shape_cast %33 : vector<1x1x8x1xf32> to vector<8x1xf32>
    %35 = vector.shape_cast %32 : vector<8x1xf32> to vector<1x1x8x1xf32>
    tpu.vector_store %arg9[%c0_20, %c0_21, %c0_22, %c0_23], %35 {strides = array<i32>} : memref<1x1x8x1xf32, #tpu.memory_space<vmem>>, vector<1x1x8x1xf32>,
    %36 = arith.mulf %26, %26 : vector<8x128xf32>
    %cst_24 = arith.constant dense<0.000000e+00> : vector<8xf32>
    %37 = vector.multi_reduction <add>, %36, %cst_24 [1] : vector<8x128xf32> to vector<8xf32>
    %38 = vector.shape_cast %37 : vector<8xf32> to vector<8x1xf32>
    %c0_25 = arith.constant 0 : index
    %c0_26 = arith.constant 0 : index
    %c0_27 = arith.constant 0 : index
    %c0_28 = arith.constant 0 : index
    %39 = vector.load %arg10[%c0_25, %c0_26, %c0_27, %c0_28] : memref<1x1x8x1xf32, #tpu.memory_space<vmem>>, vector<1x1x8x1xf32>
    %40 = vector.shape_cast %39 : vector<1x1x8x1xf32> to vector<8x1xf32>
    %41 = vector.shape_cast %38 : vector<8x1xf32> to vector<1x1x8x1xf32>
    tpu.vector_store %arg10[%c0_25, %c0_26, %c0_27, %c0_28], %41 {strides = array<i32>} : memref<1x1x8x1xf32, #tpu.memory_space<vmem>>, vector<1x1x8x1xf32>,
    return
  }
  func.func @transform_0(%arg0: i32, %arg1: i32) -> (i32, i32, i32) {
    %c0_i32 = arith.constant 0 : i32
    %c0_i32_0 = arith.constant 0 : i32
    return %arg0, %arg1, %c0_i32 : i32, i32, i32
  }
  func.func @transform_1(%arg0: i32, %arg1: i32) -> (i32, i32, i32) {
    %c0_i32 = arith.constant 0 : i32
    %c0_i32_0 = arith.constant 0 : i32
    return %arg0, %arg1, %c0_i32 : i32, i32, i32
  }
  func.func @transform_2(%arg0: i32, %arg1: i32) -> (i32, i32) {
    %c0_i32 = arith.constant 0 : i32
    %c0_i32_0 = arith.constant 0 : i32
    %c0_i32_1 = arith.constant 0 : i32
    return %c0_i32, %c0_i32_0 : i32, i32
  }
  func.func @transform_3(%arg0: i32, %arg1: i32) -> (i32, i32) {
    %c0_i32 = arith.constant 0 : i32
    %c0_i32_0 = arith.constant 0 : i32
    %c0_i32_1 = arith.constant 0 : i32
    return %c0_i32, %c0_i32_0 : i32, i32
  }
  func.func @transform_4(%arg0: i32, %arg1: i32) -> (i32, i32) {
    %c0_i32 = arith.constant 0 : i32
    %c0_i32_0 = arith.constant 0 : i32
    %c0_i32_1 = arith.constant 0 : i32
    return %c0_i32, %c0_i32_0 : i32, i32
  }
  func.func @transform_5(%arg0: i32, %arg1: i32) -> (i32, i32) {
    %c0_i32 = arith.constant 0 : i32
    %c0_i32_0 = arith.constant 0 : i32
    %c0_i32_1 = arith.constant 0 : i32
    return %c0_i32, %c0_i32_0 : i32, i32
  }
  func.func @transform_6(%arg0: i32, %arg1: i32) -> (i32, i32, i32) {
    %c0_i32 = arith.constant 0 : i32
    %c0_i32_0 = arith.constant 0 : i32
    return %arg0, %c0_i32, %arg1 : i32, i32, i32
  }
  func.func @transform_7(%arg0: i32, %arg1: i32) -> (i32, i32, i32, i32) {
    %c0_i32 = arith.constant 0 : i32
    %c0_i32_0 = arith.constant 0 : i32
    %c0_i32_1 = arith.constant 0 : i32
    return %arg0, %arg1, %c0_i32, %c0_i32_0 : i32, i32, i32, i32
  }
  func.func @transform_8(%arg0: i32, %arg1: i32) -> (i32, i32, i32, i32) {
    %c0_i32 = arith.constant 0 : i32
    %c0_i32_0 = arith.constant 0 : i32
    %c0_i32_1 = arith.constant 0 : i32
    return %arg0, %arg1, %c0_i32, %c0_i32_0 : i32, i32, i32, i32
  }
}

module attributes {stable_mosaic.version = 11 : i64} {
  func.func @_bn2_affine_kernel(%arg0: i32, %arg1: i32, %arg2: memref<1x8x128xbf16, #tpu.memory_space<vmem>>, %arg3: memref<8x1xf32, #tpu.memory_space<vmem>>, %arg4: memref<8x1xf32, #tpu.memory_space<vmem>>, %arg5: memref<1x8x128xf32, #tpu.memory_space<vmem>>) attributes {dimension_semantics = [#tpu.dimension_semantics<parallel>, #tpu.dimension_semantics<parallel>], iteration_bounds = array<i64: 2, 2>, scalar_prefetch = 0 : i64, scratch_operands = 0 : i64, tpu.core_type = #tpu.core_type<tc>, window_params = [{transform_indices = @transform_0, window_bounds = array<i64: 1, 8, 128>}, {pipeline_mode = #tpu.pipeline_mode<synchronous>, transform_indices = @transform_1, window_bounds = array<i64: 8, 1>}, {pipeline_mode = #tpu.pipeline_mode<synchronous>, transform_indices = @transform_2, window_bounds = array<i64: 8, 1>}, {transform_indices = @transform_3, window_bounds = array<i64: 1, 8, 128>}]} {
    %c0 = arith.constant 0 : index
    %c0_0 = arith.constant 0 : index
    %c0_1 = arith.constant 0 : index
    %0 = vector.load %arg2[%c0, %c0_0, %c0_1] : memref<1x8x128xbf16, #tpu.memory_space<vmem>>, vector<1x8x128xbf16>
    %1 = vector.shape_cast %0 : vector<1x8x128xbf16> to vector<8x128xbf16>
    %2 = arith.extf %1 : vector<8x128xbf16> to vector<8x128xf32>
    %c0_2 = arith.constant 0 : index
    %c0_3 = arith.constant 0 : index
    %3 = vector.load %arg3[%c0_2, %c0_3] : memref<8x1xf32, #tpu.memory_space<vmem>>, vector<8x1xf32>
    %4 = vector.broadcast %3 : vector<8x1xf32> to vector<8x128xf32>
    %5 = arith.mulf %2, %4 : vector<8x128xf32>
    %c0_4 = arith.constant 0 : index
    %c0_5 = arith.constant 0 : index
    %6 = vector.load %arg4[%c0_4, %c0_5] : memref<8x1xf32, #tpu.memory_space<vmem>>, vector<8x1xf32>
    %7 = vector.broadcast %6 : vector<8x1xf32> to vector<8x128xf32>
    %8 = arith.addf %5, %7 : vector<8x128xf32>
    %c0_6 = arith.constant 0 : index
    %c0_7 = arith.constant 0 : index
    %c0_8 = arith.constant 0 : index
    %9 = vector.load %arg5[%c0_6, %c0_7, %c0_8] : memref<1x8x128xf32, #tpu.memory_space<vmem>>, vector<1x8x128xf32>
    %10 = vector.shape_cast %9 : vector<1x8x128xf32> to vector<8x128xf32>
    %11 = vector.shape_cast %8 : vector<8x128xf32> to vector<1x8x128xf32>
    tpu.vector_store %arg5[%c0_6, %c0_7, %c0_8], %11 {strides = array<i32>} : memref<1x8x128xf32, #tpu.memory_space<vmem>>, vector<1x8x128xf32>,
    return
  }
  func.func @transform_0(%arg0: i32, %arg1: i32) -> (i32, i32, i32) {
    %c0_i32 = arith.constant 0 : i32
    %c0_i32_0 = arith.constant 0 : i32
    return %arg0, %c0_i32, %arg1 : i32, i32, i32
  }
  func.func @transform_1(%arg0: i32, %arg1: i32) -> (i32, i32) {
    %c0_i32 = arith.constant 0 : i32
    %c0_i32_0 = arith.constant 0 : i32
    %c0_i32_1 = arith.constant 0 : i32
    return %c0_i32, %c0_i32_0 : i32, i32
  }
  func.func @transform_2(%arg0: i32, %arg1: i32) -> (i32, i32) {
    %c0_i32 = arith.constant 0 : i32
    %c0_i32_0 = arith.constant 0 : i32
    %c0_i32_1 = arith.constant 0 : i32
    return %c0_i32, %c0_i32_0 : i32, i32
  }
  func.func @transform_3(%arg0: i32, %arg1: i32) -> (i32, i32, i32) {
    %c0_i32 = arith.constant 0 : i32
    %c0_i32_0 = arith.constant 0 : i32
    return %arg0, %c0_i32, %arg1 : i32, i32, i32
  }
}

</mosaic_0001>

<bundles_post_ra>
// kernel: conv_mixer_forward.5
= control target key start
LH: loop header
LB: loop body
LE: loop exit
PB: predicated region body
PF: predicated region fallthrough
CT: control target
= control target key end

     0   :  { %s419_s12 = smov 0   ;;  %s421_s13 = smov 0   ;;  %s476_s0 = inlined_call_operand.vmem [shape: bf16[2,8,256], index: 0, kind: input, shape index: {}]   ;;  %s477_s1 = inlined_call_operand.vmem [shape: f32[8,1], index: 1, kind: input, shape index: {}]   ;;  %s478_s2 = inlined_call_operand.vmem [shape: f32[8,1], index: 2, kind: input, shape index: {}]   ;;  %s479_s3 = inlined_call_operand.vmem [shape: f32[2,8,256], index: 3, kind: output, shape index: {}]  }
   0x1   :  { %s423_s14 = smov 0   ;;  %s425_s15 = smov 0  }
   0x2   :  { %s427_s16 = smov 0  }
   0x3 LB: > { %s22_s17 = sadd.s32 1, %s388_s14  ;;  %s25_s18 = sadd.s32 1, %s392_s15  ;;  %s396_s16 = sphi %s427_s16, %s13_s16   ;;  %s392_s15 = sphi %s425_s15, %s483_s15   ;;  %s388_s14 = sphi %s423_s14, %s482_s14   ;;  %s384_s13 = sphi %s421_s13, %s481_s13   ;;  %s380_s12 = sphi %s419_s12, %s480_s12  }
   0x4   : > { %p23_p0 = scmp.ge.s32.totalorder %s22_s17, 2  ;;  %p309_p1 = scmp.ge.s32.totalorder %s396_s16, 1 }
   0x5   : > { %p156_p2 = scmp.lt.s32.totalorder %s396_s16, 5 }
   0x6   : > { %s485_s17 = smov (%p23_p0, %s22_s17), 0  ;;  %s487_s18 = smov (!%p23_p0, %s25_s18), %s392_s15 }
   0x7   : > { %p157_p3 = pnand %p309_p1, %p156_p2  ;;  %p27_p4 = scmp.ge.s32.totalorder %s487_s18, 2 }
   0x8   : > { %p186_p5 = scmp.lt.s32.totalorder (!%p157_p3), %s384_s13, 1  ;;  %p188_p6 = scmp.lt.s32.totalorder (!%p157_p3), %s380_s12, 1 }
   0x9   : > { %s489_s18 = smov (%p27_p4, %s487_s18), 0  ;;  %160 = sbr.rel (%p157_p3) target bundleno = 147 (0x93), region = 32 }
   0xe   : > { %v204_v0 = vld [vmem:[%s477_s1] sm:$0xff]  ;;  %v398_v1 = vmov 0   ;;  %s491_s13 = smov (!%p186_p5, %s384_s13), 1  ;;  %s493_s12 = smov (!%p188_p6, %s380_s12), 1 }
   0xf   : > { %357 = vset.pattern.permute.xlu0 %v398_v1  ;;  %v211_v2 = vld [vmem:[%s478_s2] sm:$0xff]  ;;  %s310_s23 = sshll.u32 %s491_s13, 1 }
  0x10   : > { %207 = vperm.xlu0 %357, %v204_v0   ;;  %s191_s24 = sadd.s32 %s310_s23, %s493_s12 }
  0x11   : > { %s311_s25 = sshll.u32 %s191_s24, 2  ;;  %s313_s29 = sshll.u32 %s191_s24, 3 }
  0x12   : > { %s193_s28 = scalar_lea.vmem %s476_s0, %s311_s25  ;;  %s201_s5 = scalar_lea.vmem %s479_s3, %s313_s29 }
  0x13   : > { %v202_v3 = vld [vmem:[%s193_s28] sm:$0xf] }
  0x14   : > { %214 = vperm.xlu0 %357, %v211_v2   ;;  %v203_v4 = vunpack.c.l.bf16 %v202_v3 }
  0x8b   : > { %v208_v5 = vpop.permute.xlu0 %207 }
  0x8c   : > { %v210_v6 = vmul.f32 %v208_v5, %v203_v4 }
  0x8f   : > { %v215_v7 = vpop.permute.xlu0 %214 }
  0x90   : > { %v217_v8 = vadd.f32 %v215_v7, %v210_v6 }
  0x92   : > { %218 = vst [vmem:[%s201_s5] sm:$0xff] %v217_v8 }
  0x93 PF: > { %s13_s16 = sadd.s32 1, %s396_s16   ;;  %s480_s12 = smov %s388_s14 }
  0x94   : > { %p10_p7 = scmp.ge.s32.totalorder %s13_s16, 6   ;;  %s481_s13 = smov %s392_s15 }
  0x95   : > { %s482_s14 = smov %s485_s17  ;;  %s483_s15 = smov %s489_s18 }
  0x96   :  { %12 = sbr.rel (!%p10_p7) target bundleno = 3 (0x3), region = 62 }

// kernel: conv_mixer_forward.4
= control target key start
LH: loop header
LB: loop body
LE: loop exit
PB: predicated region body
PF: predicated region fallthrough
CT: control target
= control target key end

     0   :  { %s1105_s27 = smov 0   ;;  %s1107_s28 = smov 0   ;;  %s1260_s0 = inlined_call_operand.vmem [shape: bf16[2,256,4], index: 0, kind: input, shape index: {}]   ;;  %s1261_s1 = inlined_call_operand.vmem [shape: bf16[2,256,4], index: 1, kind: input, shape index: {}]   ;;  %s1262_s2 = inlined_call_operand.vmem [shape: f32[1,4], index: 2, kind: input, shape index: {}]   ;;  %s1263_s3 = inlined_call_operand.vmem [shape: f32[1,4], index: 3, kind: input, shape index: {}]   ;;  %s1264_s4 = inlined_call_operand.vmem [shape: bf16[8,4], index: 4, kind: input, shape index: {}]   ;;  %s1265_s5 = inlined_call_operand.vmem [shape: f32[8,1], index: 5, kind: input, shape index: {}]   ;;  %s1266_s6 = inlined_call_operand.vmem [shape: bf16[2,8,256], index: 6, kind: output, shape index: {0}]   ;;  %s1267_s7 = inlined_call_operand.vmem [shape: f32[2,2,8,1], index: 7, kind: output, shape index: {1}]   ;;  %s1268_s8 = inlined_call_operand.vmem [shape: f32[2,2,8,1], index: 8, kind: output, shape index: {2}]  }
   0x1   :  { %s1109_s29 = smov 0   ;;  %s1111_s30 = smov 0  }
   0x2   :  { %s1113_s9 = smov 0  }
   0x3 LB: > { %s28_s10 = sadd.s32 1, %s1047_s29  ;;  %s31_s11 = sadd.s32 1, %s1051_s30  ;;  %s1055_s9 = sphi %s1113_s9, %s19_s9   ;;  %s1051_s30 = sphi %s1111_s30, %s1272_s30   ;;  %s1047_s29 = sphi %s1109_s29, %s1271_s29   ;;  %s1043_s28 = sphi %s1107_s28, %s1270_s28   ;;  %s1039_s27 = sphi %s1105_s27, %s1269_s27  }
   0x4   : > { %p29_p0 = scmp.ge.s32.totalorder %s28_s10, 2  ;;  %p846_p1 = scmp.ge.s32.totalorder %s1055_s9, 1 }
   0x5   : > { %p309_p2 = scmp.lt.s32.totalorder %s1055_s9, 5 }
   0x6   : > { %s1274_s10 = smov (%p29_p0, %s28_s10), 0  ;;  %s1276_s11 = smov (!%p29_p0, %s31_s11), %s1051_s30 }
   0x7   : > { %p310_p3 = pnand %p846_p1, %p309_p2  ;;  %p33_p4 = scmp.ge.s32.totalorder %s1276_s11, 2 }
   0x8   : > { %s847_s12 = sshll.u32 (!%p310_p3), %s1039_s27, 4  ;;  %p376_p5 = scmp.lt.s32.totalorder (!%p310_p3), %s1043_s28, 1 }
   0x9   : > { %s1278_s11 = smov (%p33_p4, %s1276_s11), 0  ;;  %313 = sbr.rel (%p310_p3) target bundleno = 450 (0x1c2), region = 44 }
   0xa   : > { %p378_p6 = scmp.lt.s32.totalorder (!%p310_p3), %s847_s12, 31  ;;  %p397_p7 = scmp.lt.s32.totalorder (!%p310_p3), %s1039_s27, 1 }
   0xe   : > { %v1057_v0 = vmov 0.0   ;;  %s1280_s28 = smov (!%p376_p5, %s1043_s28), 1  ;;  %vm1058_vm0 = vmmov 0   ;;  %v555_v1 = vld [vmem:[%s1265_s5] sm:$0xff]  ;;  %s1282_s12 = smov (!%p378_p6, %s847_s12), 31  ;;  %v1059_v2 = vmov 0  }
   0xf   : > { %951 = vmatprep.subr.bf16.mxu0 %v1057_v0  ;;  %967 = vmatprep.mubr.msk.bf16.mxu0 %vm1058_vm0, %v1057_v0  ;;  %s848_s15 = sshll.u32 %s1280_s28, 5  ;;  %v1159_v3 = vld [vmem:[%s1262_s2] ss:$0 sm:$0xff]  ;;  %vm561_vm1 = vcmask 31744   ;;  %s1284_s27 = smov (!%p397_p7, %s1039_s27), 1  ;;  %vm638_vm2 = vcmask 7168  }
  0x10   : > { %1014 = vset.pattern.permute.xlu0 %v1059_v2  ;;  %s381_s16 = sadd.s32 %s848_s15, %s1282_s12  ;;  %v1169_v11 = vld [vmem:[%s1263_s3] ss:$0 sm:$0xff]  ;;  %s853_s15 = sshll.u32 %s1280_s28, 1 }
  0x11   : > { %558 = vperm.xlu0 %1014, %v555_v1   ;;  %s849_s17 = sshll.u32 %s381_s16, 2  ;;  %s400_s16 = sadd.s32 %s853_s15, %s1284_s27 }
  0x12   : > { %s1149_s20 = scalar_lea.vmem %s1260_s0, %s849_s17  ;;  %s1154_s23 = scalar_lea.vmem %s1261_s1, %s849_s17 }
  0x13   : > { %v934_v4 = vld [vmem:[%s1149_s20 + $0x38] sm:$0xff]   ;;  %v933_v6 = vld [vmem:[%s1149_s20 + $0x30] sm:$0xff]   ;;  %v932_v10 = vld [vmem:[%s1149_s20 + $0x28] sm:$0xff]   ;;  %s854_s17 = sshll.u32 %s400_s16, 2  ;;  %s856_s21 = sshll.u32 %s400_s16, 3 }
  0x14   : > { %v941_v5 = vld [vmem:[%s1154_s23 + $0x38] sm:$0xff]   ;;  %v894_v7 = vunpack.c.l.bf16 %v934_v4  ;;  %v895_v8 = vunpack.c.h.bf16 %v934_v4  ;;  %v940_v9 = vld [vmem:[%s1154_s23 + $0x30] sm:$0xff]   ;;  %v890_v12 = vunpack.c.l.bf16 %v933_v6  ;;  %v891_v13 = vunpack.c.h.bf16 %v933_v6  ;;  %v939_v35 = vld [vmem:[%s1154_s23 + $0x28] sm:$0xff]   ;;  %s410_s28 = scalar_lea.vmem %s1267_s7, %s856_s21  ;;  %s418_s25 = scalar_lea.vmem %s1268_s8, %s856_s21 }
  0x15   : > { %v926_v16 = vunpack.c.l.bf16 %v941_v5  ;;  %v927_v17 = vunpack.c.h.bf16 %v941_v5  ;;  %v922_v20 = vunpack.c.l.bf16 %v940_v9  ;;  %v886_v21 = vunpack.c.l.bf16 %v932_v10  ;;  %v931_v36 = vld [vmem:[%s1149_s20 + $0x20] sm:$0xff]   ;;  %v930_v51 = vld [vmem:[%s1149_s20 + $0x18] sm:$0xff]   ;;  %v929_v2 = vld [vmem:[%s1149_s20 + $0x10] sm:$0xff]  }
  0x16   : > { %v473_v14 = vmul.f32 %v894_v7, %v1159_v3  ;;  %v474_v15 = vmul.f32 %v895_v8, %v1159_v3  ;;  %v471_v18 = vmul.f32 %v890_v12, %v1159_v3  ;;  %v472_v19 = vmul.f32 %v891_v13, %v1159_v3  ;;  %v938_v50 = vld [vmem:[%s1154_s23 + $0x20] sm:$0xff]   ;;  %v937_v1 = vld [vmem:[%s1154_s23 + $0x18] sm:$0xff]  }
  0x17   : > { %v923_v24 = vunpack.c.h.bf16 %v940_v9  ;;  %v887_v25 = vunpack.c.h.bf16 %v932_v10  ;;  %v469_v30 = vmul.f32 %v886_v21, %v1159_v3  ;;  %v918_v38 = vunpack.c.l.bf16 %v939_v35 }
  0x18   : > { %v496_v22 = vadd.f32 %v1169_v11, %v473_v14  ;;  %v497_v23 = vadd.f32 %v1169_v11, %v474_v15  ;;  %v494_v26 = vadd.f32 %v1169_v11, %v471_v18  ;;  %v495_v27 = vadd.f32 %v1169_v11, %v472_v19  ;;  %v928_v18 = vld [vmem:[%s1149_s20 + $0x8] sm:$0xff]  }
  0x19   : > { %v470_v34 = vmul.f32 %v887_v25, %v1159_v3  ;;  %v882_v39 = vunpack.c.l.bf16 %v931_v36  ;;  %v883_v40 = vunpack.c.h.bf16 %v931_v36  ;;  %v492_v42 = vadd.f32 %v1169_v11, %v469_v30 }
  0x1a   : > { %v544_v28 = vadd.f32 %v926_v16, %v496_v22  ;;  %v545_v29 = vadd.f32 %v927_v17, %v497_v23  ;;  %v542_v32 = vadd.f32 %v922_v20, %v494_v26  ;;  %v543_v33 = vadd.f32 %v923_v24, %v495_v27  ;;  %v936_v17 = vld [vmem:[%s1154_s23 + $0x10] sm:$0xff]  }
  0x1b   : > { %v493_v43 = vadd.f32 %v1169_v11, %v470_v34  ;;  %v919_v44 = vunpack.c.h.bf16 %v939_v35  ;;  %v467_v45 = vmul.f32 %v882_v39, %v1159_v3  ;;  %v468_v46 = vmul.f32 %v883_v40, %v1159_v3 }
  0x1c   : > { %v554_v31 = vpack.c.bf16 %v545_v29, %v544_v28  ;;  %v553_v41 = vpack.c.bf16 %v543_v33, %v542_v32  ;;  %v540_v48 = vadd.f32 %v918_v38, %v492_v42  ;;  %v914_v54 = vunpack.c.l.bf16 %v938_v50  ;;  %v865_v32 = vld [vmem:[%s1149_s20] sm:$0xff]   ;;  %s402_s20 = scalar_lea.vmem %s1266_s6, %s854_s17 }
  0x1d   : > { %v541_v49 = vadd.f32 %v919_v44, %v493_v43  ;;  %v490_v52 = vadd.f32 %v1169_v11, %v467_v45  ;;  %v491_v53 = vadd.f32 %v1169_v11, %v468_v46  ;;  %v915_v55 = vunpack.c.h.bf16 %v938_v50  ;;  %v897_v45 = vld [vmem:[%s1154_s23] sm:$0xff]  }
  0x1e   : > { %v587_v37 = vsel %vm561_vm1, %v554_v31, 0  ;;  %v584_v47 = vsel %vm561_vm1, %v553_v41, 0  ;;  %v878_v57 = vunpack.c.l.bf16 %v930_v51  ;;  %v879_v58 = vunpack.c.h.bf16 %v930_v51  ;;  %v935_v31 = vld [vmem:[%s1154_s23 + $0x8] sm:$0xff]  }
  0x1f   : > { %952 = vmatpush3.bf16.xpose.msra.mxu0 %v587_v37  ;;  %v552_v56 = vpack.c.bf16 %v541_v49, %v540_v48  ;;  %v538_v59 = vadd.f32 %v914_v54, %v490_v52  ;;  %v539_v60 = vadd.f32 %v915_v55, %v491_v53  ;;  %v910_v5 = vunpack.c.l.bf16 %v937_v1  ;;  %v546_v55 = vld [vmem:[%s1264_s4] sm:$0xf] }
  0x20   : > { %953 = vmatprep.subr.bf16.mxu0 %v1057_v0  ;;  %v465_v62 = vmul.f32 %v878_v57, %v1159_v3  ;;  %v466_v63 = vmul.f32 %v879_v58, %v1159_v3  ;;  %v911_v6 = vunpack.c.h.bf16 %v937_v1  ;;  %v874_v9 = vunpack.c.l.bf16 %v929_v2 }
  0x21   : > { %v581_v61 = vsel %vm561_vm1, %v552_v56, 0  ;;  %v551_v4 = vpack.c.bf16 %v539_v60, %v538_v59  ;;  %v875_v10 = vunpack.c.h.bf16 %v929_v2  ;;  %v906_v19 = vunpack.c.l.bf16 %v936_v17 }
  0x22   : > { %v488_v7 = vadd.f32 %v1169_v11, %v465_v62  ;;  %v489_v8 = vadd.f32 %v1169_v11, %v466_v63  ;;  %v463_v15 = vmul.f32 %v874_v9, %v1159_v3  ;;  %v907_v20 = vunpack.c.h.bf16 %v936_v17 }
  0x23   : > { %v578_v12 = vsel %vm561_vm1, %v551_v4, 0  ;;  %v464_v16 = vmul.f32 %v875_v10, %v1159_v3  ;;  %v870_v21 = vunpack.c.l.bf16 %v928_v18  ;;  %v871_v25 = vunpack.c.h.bf16 %v928_v18 }
  0x24   : > { %v536_v13 = vadd.f32 %v910_v5, %v488_v7  ;;  %v537_v14 = vadd.f32 %v911_v6, %v489_v8  ;;  %v486_v23 = vadd.f32 %v1169_v11, %v463_v15  ;;  %v902_v34 = vunpack.c.l.bf16 %v935_v31 }
  0x25   : > { %v487_v24 = vadd.f32 %v1169_v11, %v464_v16  ;;  %v461_v26 = vmul.f32 %v870_v21, %v1159_v3  ;;  %v462_v30 = vmul.f32 %v871_v25, %v1159_v3  ;;  %v903_v35 = vunpack.c.h.bf16 %v935_v31 }
  0x26   : > { %v550_v22 = vpack.c.bf16 %v537_v14, %v536_v13  ;;  %v534_v28 = vadd.f32 %v906_v19, %v486_v23  ;;  %v866_v38 = vunpack.c.l.bf16 %v865_v32  ;;  %v867_v39 = vunpack.c.h.bf16 %v865_v32 }
  0x27   : > { %954 = vmatpush3.bf16.xpose.msra.mxu0 %v584_v47  ;;  %v535_v29 = vadd.f32 %v907_v20, %v487_v24  ;;  %v484_v33 = vadd.f32 %v1169_v11, %v461_v26  ;;  %v485_v37 = vadd.f32 %v1169_v11, %v462_v30  ;;  %v898_v46 = vunpack.c.l.bf16 %v897_v45 }
  0x28   : > { %955 = vmatprep.subr.bf16.mxu0 %v1057_v0  ;;  %v575_v27 = vsel %vm561_vm1, %v550_v22, 0  ;;  %v459_v43 = vmul.f32 %v866_v38, %v1159_v3  ;;  %v460_v44 = vmul.f32 %v867_v39, %v1159_v3  ;;  %v899_v50 = vunpack.c.h.bf16 %v897_v45 }
  0x29   : > { %v549_v36 = vpack.c.bf16 %v535_v29, %v534_v28  ;;  %v532_v40 = vadd.f32 %v902_v34, %v484_v33  ;;  %v533_v42 = vadd.f32 %v903_v35, %v485_v37 }
  0x2a   : > { %v482_v48 = vadd.f32 %v1169_v11, %v459_v43  ;;  %v483_v49 = vadd.f32 %v1169_v11, %v460_v44 }
  0x2b   : > { %v572_v41 = vsel %vm561_vm1, %v549_v36, 0  ;;  %v548_v47 = vpack.c.bf16 %v533_v42, %v532_v40 }
  0x2c   : > { %v530_v52 = vadd.f32 %v898_v46, %v482_v48  ;;  %v531_v53 = vadd.f32 %v899_v50, %v483_v49 }
  0x2d   : > { %v569_v51 = vsel %vm561_vm1, %v548_v47, 0 }
  0x2e   : > { %v547_v3 = vpack.c.bf16 %v531_v53, %v530_v52 }
  0x2f   : > { %956 = vmatpush3.bf16.xpose.msra.mxu0 %v581_v61 }
  0x30   : > { %957 = vmatprep.subr.bf16.mxu0 %v1057_v0  ;;  %v566_v54 = vsel %vm561_vm1, %v547_v3, 0 }
  0x37   : > { %958 = vmatpush3.bf16.xpose.msra.mxu0 %v578_v12 }
  0x38   : > { %959 = vmatprep.subr.bf16.mxu0 %v1057_v0 }
  0x3f   : > { %960 = vmatpush3.bf16.xpose.msra.mxu0 %v575_v27 }
  0x40   : > { %961 = vmatprep.subr.bf16.mxu0 %v1057_v0 }
  0x47   : > { %962 = vmatpush3.bf16.xpose.msra.mxu0 %v572_v41 }
  0x48   : > { %963 = vmatprep.subr.bf16.mxu0 %v1057_v0 }
  0x4f   : > { %964 = vmatpush3.bf16.xpose.msra.mxu0 %v569_v51 }
  0x50   : > { %965 = vmatprep.subr.bf16.mxu0 %v1057_v0 }
  0x57   : > { %966 = vmatpush3.bf16.xpose.msra.mxu0 %v566_v54 }
  0x5e   : > { %968 = vmatmul.mubr.msk.bf16.vlgmr.msra.gmra.mxu0 %vm561_vm1, %v546_v55 }
  0x8c   : > { %v559_v11 = vpop.permute.xlu0 %558 }
 0x11e   : > { %v623_v56 = vpop.f32.mrf.mxu0 }
 0x11f   : > { %v624_v57 = vadd.f32 %v623_v56, %v559_v11 }
 0x120   : > { %v969_v58 = vpop.f32.mrf.mxu0 }
 0x121   : > { %v630_v59 = vmul.f32 0.70710677, %v624_v57  ;;  %v629_v62 = vmul.f32 0.5, %v624_v57 }
 0x122   : > { %v626_v60 = vpop.f32.mrf.mxu0 }
 0x123   : > { %1015 = verf.f32 %v630_v59 }
 0x124   : > { %v970_v61 = vpop.f32.mrf.mxu0 }
 0x130   : > { %v1016_v0 = vpop.eup %1015 }
 0x131   : > { %v632_v63 = vadd.f32 1.0, %v1016_v0 }
 0x133   : > { %v633_v1 = vmul.f32 %v632_v63, %v629_v62 }
 0x135   : > { %636 = vadd.xlane.f32.xlu0 %v633_v1  ;;  %v634_v2 = vpack.c.bf16 %v633_v1, %v633_v1  ;;  %v640_v4 = vmul.f32 %v633_v1, %v633_v1 }
 0x137   : > { %641 = vadd.xlane.f32.xlu1 %v640_v4  ;;  %635 = vst [vmem:[%s402_s20] sm:$0xf] %v634_v2 }
 0x1be   : > { %v637_v5 = vpop.xlane.xlu0 %636 }
 0x1bf   : > { %639 = vst.msk [vmem:[%s410_s28] sm:$0xff] %vm638_vm2, %v637_v5 }
 0x1c0   : > { %v642_v6 = vpop.xlane.xlu1 %641 }
 0x1c1   : > { %643 = vst.msk [vmem:[%s418_s25] sm:$0xff] %vm638_vm2, %v642_v6 }
 0x1c2 PF: > { %s19_s9 = sadd.s32 1, %s1055_s9   ;;  %s1269_s27 = smov %s1047_s29 }
 0x1c3   : > { %p16_p8 = scmp.ge.s32.totalorder %s19_s9, 6   ;;  %s1270_s28 = smov %s1051_s30 }
 0x1c4   : > { %s1271_s29 = smov %s1274_s10  ;;  %s1272_s30 = smov %s1278_s11 }
 0x1c5   :  { %18 = sbr.rel (!%p16_p8) target bundleno = 3 (0x3), region = 101 }

// kernel: conv_mixer_forward.3
= control target key start
LH: loop header
LB: loop body
LE: loop exit
PB: predicated region body
PF: predicated region fallthrough
CT: control target
= control target key end

     0   :  { %s2017_s18 = smov 0   ;;  %s2889_s0 = inlined_call_operand.vmem [shape: bf16[2,16,16,4], index: 0, kind: input, shape index: {}]   ;;  %s2890_s1 = inlined_call_operand.vmem [shape: f32[9,4], index: 1, kind: input, shape index: {}]   ;;  %s2891_s2 = inlined_call_operand.vmem [shape: f32[1,4], index: 2, kind: input, shape index: {}]   ;;  %s2892_s3 = inlined_call_operand.vmem [shape: bf16[2,16,16,4], index: 3, kind: output, shape index: {0}]   ;;  %s2893_s4 = inlined_call_operand.vmem [shape: f32[2,1,4], index: 4, kind: output, shape index: {1}]   ;;  %s2894_s5 = inlined_call_operand.vmem [shape: f32[2,1,4], index: 5, kind: output, shape index: {2}]  }
   0x1 LB: > { %s1745_s19 = sadd.s32 4294967295, %s1984_s18   ;;  %p1749_p0 = scmp.ge.s32.totalorder %s1984_s18, 1  ;;  %s1984_s18 = sphi %s2017_s18, %s16_s18  }
   0x2   : > { %p192_p1 = scmp.lt.s32.totalorder %s1984_s18, 3 }
   0x4   : > { %p193_p2 = pnand %p1749_p0, %p192_p1 }
   0x5   : > { %p2027_p3 = scmp.lt.s32.totalorder (!%p193_p2), %s1745_s19, 1 }
   0x6   : > { %196 = sbr.rel (%p193_p2) target bundleno = 296 (0x128), region = 32 }
   0xb   : > { %vm242_vm0 = vcmask 31744   ;;  %v492_v0 = vlaneseq  ;;  %v1986_v1 = vmov 0.0   ;;  %s2897_s19 = smov (!%p2027_p3, %s1745_s19), 1  ;;  %v2082_v3 = vld [vmem:[%s2890_s1] sm:$0xff]  ;;  %vm1430_vm1 = vcmask 27648  }
   0xc   : > { %243 = vst.msk [vmem:[#allocation2] sm:$0xff] %vm242_vm0, %v1986_v1  ;;  %244 = vst.msk [vmem:[#allocation2 + $0x8] sm:$0xff] %vm242_vm0, %v1986_v1  ;;  %s1790_s23 = sshll.u32 %s2897_s19, 7  ;;  %s238_s15 = scalar_lea.vmem %s2893_s4, %s2897_s19  ;;  %vm1534_vm2 = vcmask 24576  }
   0xd   : > { %245 = vst.msk [vmem:[#allocation2 + $0x10] sm:$0xff] %vm242_vm0, %v1986_v1  ;;  %246 = vst.msk [vmem:[#allocation2 + $0x18] sm:$0xff] %vm242_vm0, %v1986_v1  ;;  %v2077_v2 = vshrl.u32 %v492_v0, 7  ;;  %s2094_s26 = scalar_lea.vmem %s2889_s0, %s1790_s23  ;;  %s2265_s8 = scalar_lea.vmem %s2892_s3, %s1790_s23 }
   0xe   : > { %248 = vst.msk [vmem:[#allocation2 + $0x220] sm:$0xff] %vm242_vm0, %v1986_v1  ;;  %249 = vst.msk [vmem:[#allocation2 + $0x228] sm:$0xff] %vm242_vm0, %v1986_v1  ;;  %v1825_v9 = vld [vmem:[%s2094_s26] sm:$0xff]   ;;  %v1888_v10 = vld [vmem:[%s2094_s26 + $0x8] sm:$0xff]   ;;  %s241_s20 = scalar_lea.vmem %s2894_s5, %s2897_s19 }
   0xf   : > { %250 = vst.msk [vmem:[#allocation2 + $0x230] sm:$0xff] %vm242_vm0, %v1986_v1  ;;  %251 = vst.msk [vmem:[#allocation2 + $0x238] sm:$0xff] %vm242_vm0, %v1986_v1  ;;  %v494_v4 = vsub.s32 0, %v2077_v2  ;;  %v562_v5 = vsub.s32 1, %v2077_v2  ;;  %v630_v6 = vsub.s32 2, %v2077_v2  ;;  %v698_v7 = vsub.s32 3, %v2077_v2 }
  0x10   : > { %253 = vst.msk [vmem:[#allocation2 + $0x20] sm:$0xff] %vm242_vm0, %v1986_v1  ;;  %254 = vst.msk [vmem:[#allocation2 + $0x40] sm:$0xff] %vm242_vm0, %v1986_v1  ;;  %v766_v8 = vsub.s32 4, %v2077_v2  ;;  %v1889_v11 = vld [vmem:[%s2094_s26 + $0x10] sm:$0xff]   ;;  %v1826_v16 = vunpack.c.l.bf16 %v1825_v9  ;;  %v1827_v17 = vunpack.c.h.bf16 %v1825_v9  ;;  %v1830_v18 = vunpack.c.l.bf16 %v1888_v10  ;;  %v1890_v20 = vld [vmem:[%s2094_s26 + $0x18] sm:$0xff]  }
  0x11   : > { %255 = vst.msk [vmem:[#allocation2 + $0x60] sm:$0xff] %vm242_vm0, %v1986_v1  ;;  %256 = vst.msk [vmem:[#allocation2 + $0x80] sm:$0xff] %vm242_vm0, %v1986_v1  ;;  %v2101_v12 = vrot.slane %v2082_v3, %v494_v4  ;;  %v2104_v13 = vrot.slane %v2082_v3, %v562_v5  ;;  %v2107_v14 = vrot.slane %v2082_v3, %v630_v6  ;;  %v1831_v19 = vunpack.c.h.bf16 %v1888_v10  ;;  %v1891_v21 = vld [vmem:[%s2094_s26 + $0x20] sm:$0xff]   ;;  %v1892_v22 = vld [vmem:[%s2094_s26 + $0x28] sm:$0xff]  }
  0x12   : > { %257 = vst.msk [vmem:[#allocation2 + $0xa0] sm:$0xff] %vm242_vm0, %v1986_v1  ;;  %258 = vst.msk [vmem:[#allocation2 + $0xc0] sm:$0xff] %vm242_vm0, %v1986_v1  ;;  %v2110_v15 = vrot.slane %v2082_v3, %v698_v7  ;;  %v1834_v23 = vunpack.c.l.bf16 %v1889_v11  ;;  %v1835_v24 = vunpack.c.h.bf16 %v1889_v11  ;;  %v1838_v25 = vunpack.c.l.bf16 %v1890_v20  ;;  %v1893_v27 = vld [vmem:[%s2094_s26 + $0x30] sm:$0xff]   ;;  %v1894_v28 = vld [vmem:[%s2094_s26 + $0x38] sm:$0xff]  }
  0x13   : > { %259 = vst.msk [vmem:[#allocation2 + $0xe0] sm:$0xff] %vm242_vm0, %v1986_v1  ;;  %260 = vst.msk [vmem:[#allocation2 + $0x100] sm:$0xff] %vm242_vm0, %v1986_v1  ;;  %v1839_v26 = vunpack.c.h.bf16 %v1890_v20  ;;  %v1895_v29 = vld [vmem:[%s2094_s26 + $0x40] sm:$0xff]   ;;  %v1842_v30 = vunpack.c.l.bf16 %v1891_v21  ;;  %v1843_v31 = vunpack.c.h.bf16 %v1891_v21  ;;  %v1846_v32 = vunpack.c.l.bf16 %v1892_v22  ;;  %v1896_v34 = vld [vmem:[%s2094_s26 + $0x48] sm:$0xff]  }
  0x14   : > { %261 = vst.msk [vmem:[#allocation2 + $0x120] sm:$0xff] %vm242_vm0, %v1986_v1  ;;  %262 = vst.msk [vmem:[#allocation2 + $0x140] sm:$0xff] %vm242_vm0, %v1986_v1  ;;  %v1847_v33 = vunpack.c.h.bf16 %v1892_v22  ;;  %v1897_v35 = vld [vmem:[%s2094_s26 + $0x50] sm:$0xff]   ;;  %v1898_v36 = vld [vmem:[%s2094_s26 + $0x58] sm:$0xff]   ;;  %v1850_v37 = vunpack.c.l.bf16 %v1893_v27  ;;  %v1851_v38 = vunpack.c.h.bf16 %v1893_v27  ;;  %v1854_v39 = vunpack.c.l.bf16 %v1894_v28 }
  0x15   : > { %263 = vst.msk [vmem:[#allocation2 + $0x160] sm:$0xff] %vm242_vm0, %v1986_v1  ;;  %264 = vst.msk [vmem:[#allocation2 + $0x180] sm:$0xff] %vm242_vm0, %v1986_v1  ;;  %v1855_v40 = vunpack.c.h.bf16 %v1894_v28  ;;  %v1899_v41 = vld [vmem:[%s2094_s26 + $0x60] sm:$0xff]   ;;  %v1900_v42 = vld [vmem:[%s2094_s26 + $0x68] sm:$0xff]   ;;  %v1858_v43 = vunpack.c.l.bf16 %v1895_v29  ;;  %v1859_v44 = vunpack.c.h.bf16 %v1895_v29  ;;  %v1862_v45 = vunpack.c.l.bf16 %v1896_v34 }
  0x16   : > { %265 = vst.msk [vmem:[#allocation2 + $0x1a0] sm:$0xff] %vm242_vm0, %v1986_v1  ;;  %266 = vst.msk [vmem:[#allocation2 + $0x1c0] sm:$0xff] %vm242_vm0, %v1986_v1  ;;  %v1863_v46 = vunpack.c.h.bf16 %v1896_v34  ;;  %v1901_v47 = vld [vmem:[%s2094_s26 + $0x70] sm:$0xff]   ;;  %v1902_v48 = vld [vmem:[%s2094_s26 + $0x78] sm:$0xff]   ;;  %v1866_v49 = vunpack.c.l.bf16 %v1897_v35  ;;  %v1867_v50 = vunpack.c.h.bf16 %v1897_v35  ;;  %v1870_v51 = vunpack.c.l.bf16 %v1898_v36 }
  0x17   : > { %267 = vst.msk [vmem:[#allocation2 + $0x1e0] sm:$0xff] %vm242_vm0, %v1986_v1  ;;  %268 = vst.msk [vmem:[#allocation2 + $0x200] sm:$0xff] %vm242_vm0, %v1986_v1  ;;  %v1871_v52 = vunpack.c.h.bf16 %v1898_v36  ;;  %v384_v53 = vld [vmem:[#allocation2 + $0x7] sm:$0xff]  ;;  %v1874_v56 = vunpack.c.l.bf16 %v1899_v41  ;;  %v1875_v57 = vunpack.c.h.bf16 %v1899_v41  ;;  %v1878_v58 = vunpack.c.l.bf16 %v1900_v42  ;;  %v385_v11 = vld [vmem:[#allocation2 + $0xf] sm:$0xff] }
  0x18   : > { %269 = vst.msk [vmem:[#allocation2 + $0x38] sm:$0xff] %vm242_vm0, %v1986_v1  ;;  %270 = vst.msk [vmem:[#allocation2 + $0x58] sm:$0xff] %vm242_vm0, %v1986_v1  ;;  %v420_v54 = vld [vmem:[#allocation2 + $0x8] sm:$0xff]  ;;  %v1879_v59 = vunpack.c.h.bf16 %v1900_v42  ;;  %v1882_v60 = vunpack.c.l.bf16 %v1901_v47  ;;  %v1883_v61 = vunpack.c.h.bf16 %v1901_v47  ;;  %v1886_v62 = vunpack.c.l.bf16 %v1902_v48 }
  0x19   : > { %271 = vst.msk [vmem:[#allocation2 + $0x78] sm:$0xff] %vm242_vm0, %v1986_v1  ;;  %272 = vst.msk [vmem:[#allocation2 + $0x98] sm:$0xff] %vm242_vm0, %v1986_v1  ;;  %v456_v55 = vld [vmem:[#allocation2 + $0x9] sm:$0xff]  ;;  %v1887_v63 = vunpack.c.h.bf16 %v1902_v48  ;;  %v496_v0 = vmul.f32 %v2101_v12, %v384_v53  ;;  %v834_v5 = vsub.s32 5, %v2077_v2  ;;  %v902_v7 = vsub.s32 6, %v2077_v2 }
  0x1a   : > { %273 = vst.msk [vmem:[#allocation2 + $0xb8] sm:$0xff] %vm242_vm0, %v1986_v1  ;;  %274 = vst.msk [vmem:[#allocation2 + $0xd8] sm:$0xff] %vm242_vm0, %v1986_v1  ;;  %v632_v4 = vmul.f32 %v2107_v14, %v456_v55  ;;  %v2165_v10 = vrot.slane %v2082_v3, %v766_v8  ;;  %v970_v20 = vsub.s32 7, %v2077_v2  ;;  %v497_v8 = vmul.f32 %v2101_v12, %v385_v11 }
  0x1b   : > { %275 = vst.msk [vmem:[#allocation2 + $0xf8] sm:$0xff] %vm242_vm0, %v1986_v1  ;;  %276 = vst.msk [vmem:[#allocation2 + $0x118] sm:$0xff] %vm242_vm0, %v1986_v1  ;;  %v2170_v22 = vrot.slane %v2082_v3, %v834_v5  ;;  %v2209_v5 = vld [vmem:[%s2891_s2] ss:$0 sm:$0xff] }
  0x1c   : > { %277 = vst.msk [vmem:[#allocation2 + $0x138] sm:$0xff] %vm242_vm0, %v1986_v1  ;;  %278 = vst.msk [vmem:[#allocation2 + $0x158] sm:$0xff] %vm242_vm0, %v1986_v1 }
  0x1d   : > { %279 = vst.msk [vmem:[#allocation2 + $0x178] sm:$0xff] %vm242_vm0, %v1986_v1  ;;  %280 = vst.msk [vmem:[#allocation2 + $0x198] sm:$0xff] %vm242_vm0, %v1986_v1 }
  0x1e   : > { %281 = vst.msk [vmem:[#allocation2 + $0x1b8] sm:$0xff] %vm242_vm0, %v1986_v1  ;;  %282 = vst.msk [vmem:[#allocation2 + $0x1d8] sm:$0xff] %vm242_vm0, %v1986_v1 }
  0x1f   : > { %283 = vst.msk [vmem:[#allocation2 + $0x1f8] sm:$0xff] %vm242_vm0, %v1986_v1  ;;  %284 = vst.msk [vmem:[#allocation2 + $0x218] sm:$0xff] %vm242_vm0, %v1986_v1  ;;  %v564_v1 = vmul.f32 %v2104_v13, %v420_v54 }
  0x20   : > { %349 = vst.msk [vmem:[#allocation2 + $0x28] sm:$0xff] %vm242_vm0, %v1826_v16  ;;  %350 = vst.msk [vmem:[#allocation2 + $0x30] sm:$0xff] %vm242_vm0, %v1827_v17 }
  0x21   : > { %351 = vst.msk [vmem:[#allocation2 + $0x48] sm:$0xff] %vm242_vm0, %v1830_v18  ;;  %352 = vst.msk [vmem:[#allocation2 + $0x50] sm:$0xff] %vm242_vm0, %v1831_v19  ;;  %v596_v9 = vadd.f32 %v564_v1, %v496_v0 }
  0x22   : > { %353 = vst.msk [vmem:[#allocation2 + $0x68] sm:$0xff] %vm242_vm0, %v1834_v23  ;;  %354 = vst.msk [vmem:[#allocation2 + $0x70] sm:$0xff] %vm242_vm0, %v1835_v24  ;;  %v421_v23 = vld [vmem:[#allocation2 + $0x10] sm:$0xff] }
  0x23   : > { %355 = vst.msk [vmem:[#allocation2 + $0x88] sm:$0xff] %vm242_vm0, %v1838_v25  ;;  %356 = vst.msk [vmem:[#allocation2 + $0x90] sm:$0xff] %vm242_vm0, %v1839_v26  ;;  %v664_v21 = vadd.f32 %v632_v4, %v596_v9  ;;  %v2173_v25 = vrot.slane %v2082_v3, %v902_v7  ;;  %v457_v26 = vld [vmem:[#allocation2 + $0x11] sm:$0xff] }
  0x24   : > { %357 = vst.msk [vmem:[#allocation2 + $0xa8] sm:$0xff] %vm242_vm0, %v1842_v30  ;;  %358 = vst.msk [vmem:[#allocation2 + $0xb0] sm:$0xff] %vm242_vm0, %v1843_v31 }
  0x25   : > { %359 = vst.msk [vmem:[#allocation2 + $0xc8] sm:$0xff] %vm242_vm0, %v1846_v32  ;;  %360 = vst.msk [vmem:[#allocation2 + $0xd0] sm:$0xff] %vm242_vm0, %v1847_v33  ;;  %v2180_v32 = vrot.slane %v2082_v3, %v970_v20  ;;  %v565_v33 = vmul.f32 %v2104_v13, %v421_v23  ;;  %v2192_v3 = vld [vmem:[%s2890_s1 + $0x8] ss:$0 sm:$0xff] }
  0x26   : > { %361 = vst.msk [vmem:[#allocation2 + $0xe8] sm:$0xff] %vm242_vm0, %v1850_v37  ;;  %362 = vst.msk [vmem:[#allocation2 + $0xf0] sm:$0xff] %vm242_vm0, %v1851_v38  ;;  %v633_v37 = vmul.f32 %v2107_v14, %v457_v26 }
  0x27   : > { %363 = vst.msk [vmem:[#allocation2 + $0x108] sm:$0xff] %vm242_vm0, %v1854_v39  ;;  %364 = vst.msk [vmem:[#allocation2 + $0x110] sm:$0xff] %vm242_vm0, %v1855_v40  ;;  %v386_v6 = vld [vmem:[#allocation2 + $0x27] sm:$0xff]  ;;  %v387_v2 = vld [vmem:[#allocation2 + $0x2f] sm:$0xff]  ;;  %v597_v42 = vadd.f32 %v565_v33, %v497_v8 }
  0x28   : > { %365 = vst.msk [vmem:[#allocation2 + $0x128] sm:$0xff] %vm242_vm0, %v1858_v43  ;;  %366 = vst.msk [vmem:[#allocation2 + $0x130] sm:$0xff] %vm242_vm0, %v1859_v44  ;;  %v388_v16 = vld [vmem:[#allocation2 + $0x47] sm:$0xff]  ;;  %v700_v19 = vmul.f32 %v2110_v15, %v386_v6  ;;  %v498_v34 = vmul.f32 %v2101_v12, %v386_v6  ;;  %v389_v40 = vld [vmem:[#allocation2 + $0x4f] sm:$0xff]  ;;  %v701_v43 = vmul.f32 %v2110_v15, %v387_v2 }
  0x29   : > { %367 = vst.msk [vmem:[#allocation2 + $0x148] sm:$0xff] %vm242_vm0, %v1862_v45  ;;  %368 = vst.msk [vmem:[#allocation2 + $0x150] sm:$0xff] %vm242_vm0, %v1863_v46  ;;  %v422_v17 = vld [vmem:[#allocation2 + $0x28] sm:$0xff]  ;;  %v500_v27 = vmul.f32 %v2101_v12, %v388_v16  ;;  %v425_v41 = vld [vmem:[#allocation2 + $0x50] sm:$0xff]  ;;  %v904_v47 = vmul.f32 %v2173_v25, %v388_v16  ;;  %v499_v1 = vmul.f32 %v2101_v12, %v387_v2 }
  0x2a   : > { %369 = vst.msk [vmem:[#allocation2 + $0x168] sm:$0xff] %vm242_vm0, %v1866_v49  ;;  %370 = vst.msk [vmem:[#allocation2 + $0x170] sm:$0xff] %vm242_vm0, %v1867_v50  ;;  %v424_v18 = vld [vmem:[#allocation2 + $0x48] sm:$0xff]  ;;  %v732_v29 = vadd.f32 %v700_v19, %v664_v21  ;;  %v768_v30 = vmul.f32 %v2165_v10, %v422_v17  ;;  %v566_v38 = vmul.f32 %v2104_v13, %v422_v17  ;;  %v423_v48 = vld [vmem:[#allocation2 + $0x30] sm:$0xff] }
  0x2b   : > { %371 = vst.msk [vmem:[#allocation2 + $0x188] sm:$0xff] %vm242_vm0, %v1870_v51  ;;  %372 = vst.msk [vmem:[#allocation2 + $0x190] sm:$0xff] %vm242_vm0, %v1871_v52  ;;  %v458_v24 = vld [vmem:[#allocation2 + $0x29] sm:$0xff]  ;;  %v568_v28 = vmul.f32 %v2104_v13, %v424_v18  ;;  %v702_v49 = vmul.f32 %v2110_v15, %v388_v16  ;;  %v770_v50 = vmul.f32 %v2165_v10, %v424_v18  ;;  %v459_v55 = vld [vmem:[#allocation2 + $0x31] sm:$0xff] }
  0x2c   : > { %373 = vst.msk [vmem:[#allocation2 + $0x1a8] sm:$0xff] %vm242_vm0, %v1874_v56  ;;  %374 = vst.msk [vmem:[#allocation2 + $0x1b0] sm:$0xff] %vm242_vm0, %v1875_v57  ;;  %v460_v31 = vld [vmem:[#allocation2 + $0x49] sm:$0xff]  ;;  %v800_v35 = vadd.f32 %v768_v30, %v732_v29  ;;  %v836_v36 = vmul.f32 %v2170_v22, %v458_v24  ;;  %v634_v39 = vmul.f32 %v2107_v14, %v458_v24 }
  0x2d   : > { %375 = vst.msk [vmem:[#allocation2 + $0x1c8] sm:$0xff] %vm242_vm0, %v1878_v58  ;;  %376 = vst.msk [vmem:[#allocation2 + $0x1d0] sm:$0xff] %vm242_vm0, %v1879_v59  ;;  %v600_v44 = vadd.f32 %v568_v28, %v500_v27  ;;  %v636_v45 = vmul.f32 %v2107_v14, %v460_v31  ;;  %v838_v51 = vmul.f32 %v2170_v22, %v460_v31  ;;  %v461_v59 = vld [vmem:[#allocation2 + $0x51] sm:$0xff]  ;;  %v390_v11 = vld [vmem:[#allocation2 + $0x67] sm:$0xff] }
  0x2e   : > { %377 = vst.msk [vmem:[#allocation2 + $0x1e8] sm:$0xff] %vm242_vm0, %v1882_v60  ;;  %378 = vst.msk [vmem:[#allocation2 + $0x1f0] sm:$0xff] %vm242_vm0, %v1883_v61  ;;  %v868_v46 = vadd.f32 %v836_v36, %v800_v35  ;;  %v665_v52 = vadd.f32 %v633_v37, %v597_v42  ;;  %v972_v54 = vmul.f32 %v2180_v32, %v424_v18  ;;  %v426_v16 = vld [vmem:[#allocation2 + $0x68] sm:$0xff] }
  0x2f   : > { %379 = vst.msk [vmem:[#allocation2 + $0x208] sm:$0xff] %vm242_vm0, %v1886_v62  ;;  %380 = vst.msk [vmem:[#allocation2 + $0x210] sm:$0xff] %vm242_vm0, %v1887_v63  ;;  %v501_v56 = vmul.f32 %v2101_v12, %v389_v40  ;;  %v569_v57 = vmul.f32 %v2104_v13, %v425_v41  ;;  %v1040_v58 = vmul.f32 %v2192_v3, %v460_v31 }
  0x30   : > { %v936_v53 = vadd.f32 %v904_v47, %v868_v46  ;;  %v733_v60 = vadd.f32 %v701_v43, %v665_v52  ;;  %v769_v61 = vmul.f32 %v2165_v10, %v423_v48  ;;  %v598_v62 = vadd.f32 %v566_v38, %v498_v34  ;;  %v462_v34 = vld [vmem:[#allocation2 + $0x69] sm:$0xff] }
  0x31   : > { %v668_v63 = vadd.f32 %v636_v45, %v600_v44  ;;  %v567_v4 = vmul.f32 %v2104_v13, %v423_v48  ;;  %v635_v6 = vmul.f32 %v2107_v14, %v459_v55  ;;  %v837_v9 = vmul.f32 %v2170_v22, %v459_v55  ;;  %v391_v45 = vld [vmem:[#allocation2 + $0x6f] sm:$0xff] }
  0x32   : > { %v1004_v0 = vadd.f32 %v972_v54, %v936_v53  ;;  %v801_v7 = vadd.f32 %v769_v61, %v733_v60  ;;  %v666_v17 = vadd.f32 %v634_v39, %v598_v62  ;;  %v601_v19 = vadd.f32 %v569_v57, %v501_v56  ;;  %v427_v46 = vld [vmem:[#allocation2 + $0x70] sm:$0xff] }
  0x33   : > { %v637_v20 = vmul.f32 %v2107_v14, %v461_v59  ;;  %v703_v21 = vmul.f32 %v2110_v15, %v389_v40  ;;  %v771_v23 = vmul.f32 %v2165_v10, %v425_v41  ;;  %v905_v26 = vmul.f32 %v2173_v25, %v389_v40  ;;  %v463_v54 = vld [vmem:[#allocation2 + $0x71] sm:$0xff] }
  0x34   : > { %v1072_v18 = vadd.f32 %v1040_v58, %v1004_v0  ;;  %v869_v24 = vadd.f32 %v837_v9, %v801_v7  ;;  %v734_v8 = vadd.f32 %v702_v49, %v666_v17  ;;  %v502_v28 = vmul.f32 %v2101_v12, %v390_v11 }
  0x35   : > { %v570_v29 = vmul.f32 %v2104_v13, %v426_v16  ;;  %v599_v30 = vadd.f32 %v567_v4, %v499_v1  ;;  %v839_v2 = vmul.f32 %v2170_v22, %v461_v59  ;;  %v973_v33 = vmul.f32 %v2180_v32, %v425_v41 }
  0x36   : > { %v2218_v27 = vadd.f32 %v2209_v5, %v1072_v18  ;;  %v937_v31 = vadd.f32 %v905_v26, %v869_v24  ;;  %v802_v35 = vadd.f32 %v770_v50, %v734_v8  ;;  %v669_v37 = vadd.f32 %v637_v20, %v601_v19 }
  0x37   : > { %v1041_v38 = vmul.f32 %v2192_v3, %v461_v59  ;;  %v667_v39 = vadd.f32 %v635_v6, %v599_v30  ;;  %v704_v42 = vmul.f32 %v2110_v15, %v390_v11  ;;  %v906_v44 = vmul.f32 %v2173_v25, %v390_v11  ;;  %v392_v11 = vld [vmem:[#allocation2 + $0x87] sm:$0xff] }
  0x38   : > { %v1174_v36 = vmul.f32 0.70710677, %v2218_v27  ;;  %v1005_v40 = vadd.f32 %v973_v33, %v937_v31  ;;  %v870_v43 = vadd.f32 %v838_v51, %v802_v35  ;;  %v602_v47 = vadd.f32 %v570_v29, %v502_v28 }
  0x39   : > { %v638_v41 = vmul.f32 %v2107_v14, %v462_v34  ;;  %v735_v48 = vadd.f32 %v703_v21, %v667_v39  ;;  %v772_v50 = vmul.f32 %v2165_v10, %v426_v16  ;;  %v974_v53 = vmul.f32 %v2180_v32, %v426_v16  ;;  %v428_v16 = vld [vmem:[#allocation2 + $0x88] sm:$0xff] }
  0x3a   : > { %1912 = verf.f32 %v1174_v36  ;;  %v1073_v49 = vadd.f32 %v1041_v38, %v1005_v40  ;;  %v938_v52 = vadd.f32 %v906_v44, %v870_v43  ;;  %v840_v55 = vmul.f32 %v2170_v22, %v462_v34  ;;  %v393_v43 = vld [vmem:[#allocation2 + $0x8f] sm:$0xff] }
  0x3b   : > { %v503_v51 = vmul.f32 %v2101_v12, %v391_v45  ;;  %v571_v56 = vmul.f32 %v2104_v13, %v427_v46  ;;  %v803_v57 = vadd.f32 %v771_v23, %v735_v48  ;;  %v1042_v60 = vmul.f32 %v2192_v3, %v462_v34  ;;  %v429_v44 = vld [vmem:[#allocation2 + $0x90] sm:$0xff] }
  0x3c   : > { %v1111_v58 = vadd.f32 %v2209_v5, %v1073_v49  ;;  %v1006_v59 = vadd.f32 %v974_v53, %v938_v52  ;;  %v736_v61 = vadd.f32 %v704_v42, %v668_v63  ;;  %v670_v62 = vadd.f32 %v638_v41, %v602_v47 }
  0x3d   : > { %v639_v0 = vmul.f32 %v2107_v14, %v463_v54  ;;  %v871_v1 = vadd.f32 %v839_v2, %v803_v57  ;;  %v907_v4 = vmul.f32 %v2173_v25, %v391_v45  ;;  %v705_v9 = vmul.f32 %v2110_v15, %v391_v45  ;;  %v464_v2 = vld [vmem:[#allocation2 + $0x89] sm:$0xff] }
  0x3e   : > { %v1175_v6 = vmul.f32 0.70710677, %v1111_v58  ;;  %v1074_v7 = vadd.f32 %v1042_v60, %v1006_v59  ;;  %v804_v17 = vadd.f32 %v772_v50, %v736_v61  ;;  %v603_v18 = vadd.f32 %v571_v56, %v503_v51 }
  0x3f   : > { %v773_v19 = vmul.f32 %v2165_v10, %v427_v46  ;;  %v939_v20 = vadd.f32 %v907_v4, %v871_v1  ;;  %v975_v21 = vmul.f32 %v2180_v32, %v427_v46  ;;  %v908_v24 = vmul.f32 %v2173_v25, %v392_v11 }
  0x40   : > { %1914 = verf.f32 %v1175_v6  ;;  %v1112_v63 = vadd.f32 %v2209_v5, %v1074_v7  ;;  %v872_v23 = vadd.f32 %v840_v55, %v804_v17  ;;  %v1043_v8 = vmul.f32 %v2192_v3, %v463_v54  ;;  %v465_v55 = vld [vmem:[#allocation2 + $0x91] sm:$0xff] }
  0x41   : > { %v1007_v26 = vadd.f32 %v975_v21, %v939_v20  ;;  %v504_v28 = vmul.f32 %v2101_v12, %v392_v11  ;;  %v572_v29 = vmul.f32 %v2104_v13, %v428_v16  ;;  %v976_v33 = vmul.f32 %v2180_v32, %v428_v16 }
  0x42   : > { %v1176_v30 = vmul.f32 0.70710677, %v1112_v63  ;;  %v940_v31 = vadd.f32 %v908_v24, %v872_v23  ;;  %v737_v34 = vadd.f32 %v705_v9, %v669_v37  ;;  %v1142_v35 = vmul.f32 0.5, %v2218_v27 }
  0x43   : > { %v671_v36 = vadd.f32 %v639_v0, %v603_v18  ;;  %v841_v38 = vmul.f32 %v2170_v22, %v463_v54  ;;  %v1075_v39 = vadd.f32 %v1043_v8, %v1007_v26  ;;  %v1044_v42 = vmul.f32 %v2192_v3, %v464_v2 }
  0x44   : > { %1916 = verf.f32 %v1176_v30  ;;  %v1008_v40 = vadd.f32 %v976_v33, %v940_v31  ;;  %v805_v45 = vadd.f32 %v773_v19, %v737_v34  ;;  %v640_v47 = vmul.f32 %v2107_v14, %v464_v2  ;;  %v430_v19 = vld [vmem:[#allocation2 + $0xa8] sm:$0xff] }
  0x45   : > { %v1113_v46 = vadd.f32 %v2209_v5, %v1075_v39  ;;  %v706_v41 = vmul.f32 %v2110_v15, %v392_v11  ;;  %v774_v37 = vmul.f32 %v2165_v10, %v428_v16  ;;  %v604_v48 = vadd.f32 %v572_v29, %v504_v28  ;;  %v466_v28 = vld [vmem:[#allocation2 + $0xa9] sm:$0xff] }
  0x46   : > { %v1076_v49 = vadd.f32 %v1044_v42, %v1008_v40  ;;  %v873_v50 = vadd.f32 %v841_v38, %v805_v45  ;;  %v909_v52 = vmul.f32 %v2173_v25, %v393_v43  ;;  %v505_v51 = vmul.f32 %v2101_v12, %v393_v43 }
  0x47   : > { %v1913_v27 = vpop.eup %1912  ;;  %v1177_v54 = vmul.f32 0.70710677, %v1113_v46  ;;  %v573_v56 = vmul.f32 %v2104_v13, %v429_v44  ;;  %v842_v57 = vmul.f32 %v2170_v22, %v464_v2  ;;  %v977_v61 = vmul.f32 %v2180_v32, %v429_v44 }
  0x48   : > { %v1238_v53 = vadd.f32 1.0, %v1913_v27  ;;  %v1114_v59 = vadd.f32 %v2209_v5, %v1076_v49  ;;  %v941_v60 = vadd.f32 %v909_v52, %v873_v50  ;;  %v1143_v1 = vmul.f32 0.5, %v1111_v58  ;;  %v394_v58 = vld [vmem:[#allocation2 + $0xa7] sm:$0xff] }
  0x49   : > { %1918 = verf.f32 %v1177_v54  ;;  %v738_v4 = vadd.f32 %v706_v41, %v670_v62  ;;  %v641_v7 = vmul.f32 %v2107_v14, %v465_v55  ;;  %v1045_v11 = vmul.f32 %v2192_v3, %v465_v55 }
  0x4a   : > { %v1270_v0 = vmul.f32 %v1238_v53, %v1142_v35  ;;  %v1178_v6 = vmul.f32 0.70710677, %v1114_v59  ;;  %v1009_v9 = vadd.f32 %v977_v61, %v941_v60  ;;  %v605_v17 = vadd.f32 %v573_v56, %v505_v51  ;;  %v395_v53 = vld [vmem:[#allocation2 + $0xaf] sm:$0xff] }
  0x4b   : > { %v707_v18 = vmul.f32 %v2110_v15, %v393_v43  ;;  %v806_v62 = vadd.f32 %v774_v37, %v738_v4  ;;  %v1144_v20 = vmul.f32 0.5, %v1112_v63  ;;  %v2270_v21 = vadd.f32 %v640_v47, %v604_v48 }
  0x4c   : > { %v1792_v16 = vpack.c.bf16 %v1270_v0, %v1270_v0  ;;  %1920 = verf.f32 %v1178_v6  ;;  %v1077_v23 = vadd.f32 %v1045_v11, %v1009_v9  ;;  %v775_v26 = vmul.f32 %v2165_v10, %v429_v44 }
  0x4d   : > { %v1915_v24 = vpop.eup %1914  ;;  %v843_v8 = vmul.f32 %v2170_v22, %v465_v55  ;;  %v874_v29 = vadd.f32 %v842_v57, %v806_v62  ;;  %v910_v30 = vmul.f32 %v2173_v25, %v394_v58  ;;  %v506_v63 = vmul.f32 %v2101_v12, %v394_v58  ;;  %v431_v57 = vld [vmem:[#allocation2 + $0xb0] sm:$0xff] }
  0x4e   : > { %1431 = vst.msk [vmem:[%s2265_s8] sm:$0xf] %vm1430_vm1, %v1792_v16  ;;  %v1239_v2 = vadd.f32 1.0, %v1915_v24  ;;  %v2278_v31 = vadd.f32 %v2209_v5, %v1077_v23  ;;  %v574_v33 = vmul.f32 %v2104_v13, %v430_v19  ;;  %v2282_v34 = vadd.f32 %v641_v7, %v605_v17 }
  0x4f   : > { %v942_v35 = vadd.f32 %v910_v30, %v874_v29  ;;  %v978_v38 = vmul.f32 %v2180_v32, %v430_v19  ;;  %v739_v39 = vadd.f32 %v707_v18, %v671_v36  ;;  %v1145_v42 = vmul.f32 0.5, %v1113_v46 }
  0x50   : > { %v1271_v40 = vmul.f32 %v1239_v2, %v1143_v1  ;;  %v1179_v43 = vmul.f32 0.70710677, %v2278_v31  ;;  %v2287_v44 = vmul.f32 %v2107_v14, %v466_v28  ;;  %v1536_v47 = vmul.f32 %v1270_v0, %v1270_v0 }
  0x51   : > { %v1917_v45 = vpop.eup %1916  ;;  %v1010_v41 = vadd.f32 %v978_v38, %v942_v35  ;;  %v1046_v37 = vmul.f32 %v2192_v3, %v466_v28  ;;  %v807_v27 = vadd.f32 %v775_v26, %v739_v39  ;;  %v2290_v50 = vadd.f32 %v574_v33, %v506_v63 }
  0x52   : > { %v1793_v48 = vpack.c.bf16 %v1271_v40, %v1271_v40  ;;  %v1240_v49 = vadd.f32 1.0, %v1917_v45  ;;  %v708_v36 = vmul.f32 %v2110_v15, %v394_v58  ;;  %1922 = verf.f32 %v1179_v43  ;;  %v467_v58 = vld [vmem:[#allocation2 + $0xb1] sm:$0xff] }
  0x53   : > { %v776_v46 = vmul.f32 %v2165_v10, %v430_v19  ;;  %v1078_v52 = vadd.f32 %v1046_v37, %v1010_v41  ;;  %v875_v54 = vadd.f32 %v843_v8, %v807_v27  ;;  %v1463_v55 = vsel %vm242_vm0, %v1270_v0, 0.0 }
  0x54   : > { %1432 = vst.msk [vmem:[%s2265_s8 + $0x4] sm:$0xf] %vm1430_vm1, %v1793_v48  ;;  %v1272_v51 = vmul.f32 %v1240_v49, %v1144_v20  ;;  %v1146_v56 = vmul.f32 0.5, %v1114_v59  ;;  %v911_v60 = vmul.f32 %v2173_v25, %v395_v53  ;;  %v1568_v61 = vsel %vm242_vm0, %v1536_v47, 0.0 }
  0x55   : > { %v844_v1 = vmul.f32 %v2170_v22, %v466_v28  ;;  %v2301_v4 = vadd.f32 %v2209_v5, %v1078_v52  ;;  %v979_v6 = vmul.f32 %v2180_v32, %v431_v57  ;;  %v507_v19 = vmul.f32 %v2101_v12, %v395_v53 }
  0x56   : > { %v1919_v7 = vpop.eup %1918  ;;  %v1794_v9 = vpack.c.bf16 %v1272_v51, %v1272_v51  ;;  %v1464_v0 = vsel %vm242_vm0, %v1272_v51, 0.0  ;;  %v1538_v11 = vmul.f32 %v1272_v51, %v1272_v51  ;;  %v943_v16 = vadd.f32 %v911_v60, %v875_v54 }
  0x57   : > { %v1465_v59 = vadd.f32 %v1464_v0, %v1463_v55  ;;  %v1241_v17 = vadd.f32 1.0, %v1919_v7  ;;  %v1180_v18 = vmul.f32 0.70710677, %v2301_v4  ;;  %v575_v20 = vmul.f32 %v2104_v13, %v431_v57 }
  0x58   : > { %1433 = vst.msk [vmem:[%s2265_s8 + $0x8] sm:$0xf] %vm1430_vm1, %v1794_v9  ;;  %v1569_v62 = vsel %vm242_vm0, %v1538_v11, 0.0  ;;  %v1011_v23 = vadd.f32 %v979_v6, %v943_v16  ;;  %v1047_v24 = vmul.f32 %v2192_v3, %v467_v58  ;;  %v1537_v8 = vmul.f32 %v1271_v40, %v1271_v40 }
  0x59   : > { %v1921_v26 = vpop.eup %1920  ;;  %v1570_v28 = vadd.f32 %v1569_v62, %v1568_v61  ;;  %v1273_v29 = vmul.f32 %v1241_v17, %v1145_v42  ;;  %1924 = verf.f32 %v1180_v18  ;;  %v643_v2 = vmul.f32 %v2107_v14, %v467_v58  ;;  %v396_v42 = vld [vmem:[#allocation2 + $0xc7] sm:$0xff] }
  0x5a   : > { %v1242_v30 = vadd.f32 1.0, %v1921_v26  ;;  %v1079_v63 = vadd.f32 %v1047_v24, %v1011_v23  ;;  %v740_v33 = vadd.f32 %v708_v36, %v2270_v21  ;;  %v1494_v35 = vsel %vm242_vm0, %v1271_v40, 0.0  ;;  %v397_v23 = vld [vmem:[#allocation2 + $0xcf] sm:$0xff] }
  0x5b   : > { %v1795_v38 = vpack.c.bf16 %v1273_v29, %v1273_v29  ;;  %v1495_v39 = vsel %vm242_vm0, %v1273_v29, 0.0  ;;  %v1539_v43 = vmul.f32 %v1273_v29, %v1273_v29  ;;  %v1599_v27 = vsel %vm242_vm0, %v1537_v8, 0.0 }
  0x5c   : > { %v1496_v45 = vadd.f32 %v1495_v39, %v1494_v35  ;;  %v1274_v47 = vmul.f32 %v1242_v30, %v1146_v56  ;;  %v2317_v41 = vadd.f32 %v2209_v5, %v1079_v63  ;;  %v808_v37 = vadd.f32 %v776_v46, %v740_v33  ;;  %v432_v56 = vld [vmem:[#allocation2 + $0xc8] sm:$0xff] }
  0x5d   : > { %1434 = vst.msk [vmem:[%s2265_s8 + $0xc] sm:$0xf] %vm1430_vm1, %v1795_v38  ;;  %v1600_v21 = vsel %vm242_vm0, %v1539_v43, 0.0  ;;  %v709_v40 = vmul.f32 %v2110_v15, %v395_v53  ;;  %v912_v48 = vmul.f32 %v2173_v25, %v396_v42  ;;  %v1147_v51 = vmul.f32 0.5, %v2278_v31  ;;  %v433_v43 = vld [vmem:[#allocation2 + $0xd0] sm:$0xff] }
  0x5e   : > { %v1601_v49 = vadd.f32 %v1600_v21, %v1599_v27  ;;  %v1796_v36 = vpack.c.bf16 %v1274_v47, %v1274_v47  ;;  %v1466_v52 = vsel %vm242_vm0, %v1274_v47, 0.0  ;;  %v1540_v54 = vmul.f32 %v1274_v47, %v1274_v47 }
  0x5f   : > { %v1467_v55 = vadd.f32 %v1466_v52, %v1465_v59  ;;  %v1181_v46 = vmul.f32 0.70710677, %v2317_v41  ;;  %v876_v60 = vadd.f32 %v844_v1, %v808_v37  ;;  %v1923_v61 = vpop.eup %1922  ;;  %v607_v53 = vadd.f32 %v575_v20, %v507_v19  ;;  %v468_v59 = vld [vmem:[#allocation2 + $0xc9] sm:$0xff] }
  0x60   : > { %1435 = vst.msk [vmem:[%s2265_s8 + $0x10] sm:$0xf] %vm1430_vm1, %v1796_v36  ;;  %v1571_v6 = vsel %vm242_vm0, %v1540_v54, 0.0  ;;  %v777_v7 = vmul.f32 %v2165_v10, %v431_v57  ;;  %v980_v9 = vmul.f32 %v2180_v32, %v432_v56  ;;  %v1243_v11 = vadd.f32 1.0, %v1923_v61 }
  0x61   : > { %v1572_v0 = vadd.f32 %v1571_v6, %v1570_v28  ;;  %1926 = verf.f32 %v1181_v46  ;;  %v944_v16 = vadd.f32 %v912_v48, %v876_v60  ;;  %v845_v31 = vmul.f32 %v2170_v22, %v467_v58  ;;  %v469_v48 = vld [vmem:[#allocation2 + $0xd1] sm:$0xff] }
  0x62   : > { %v508_v17 = vmul.f32 %v2101_v12, %v396_v42  ;;  %v576_v1 = vmul.f32 %v2104_v13, %v432_v56  ;;  %v741_v18 = vadd.f32 %v709_v40, %v2282_v34  ;;  %v1275_v62 = vmul.f32 %v1243_v11, %v1147_v51 }
  0x63   : > { %v674_v19 = vadd.f32 %v2287_v44, %v2290_v50  ;;  %v1012_v57 = vadd.f32 %v980_v9, %v944_v16  ;;  %v1048_v20 = vmul.f32 %v2192_v3, %v468_v59  ;;  %v1148_v24 = vmul.f32 0.5, %v2301_v4 }
  0x64   : > { %v675_v26 = vadd.f32 %v643_v2, %v607_v53  ;;  %v809_v58 = vadd.f32 %v777_v7, %v741_v18  ;;  %v913_v8 = vmul.f32 %v2173_v25, %v397_v23  ;;  %v1797_v28 = vpack.c.bf16 %v1275_v62, %v1275_v62  ;;  %v398_v7 = vld [vmem:[#allocation2 + $0xe7] sm:$0xff] }
  0x65   : > { %v1497_v29 = vsel %vm242_vm0, %v1275_v62, 0.0  ;;  %v1541_v30 = vmul.f32 %v1275_v62, %v1275_v62  ;;  %v1080_v34 = vadd.f32 %v1048_v20, %v1012_v57  ;;  %v608_v44 = vadd.f32 %v576_v1, %v508_v17 }
  0x66   : > { %v1925_v63 = vpop.eup %1924  ;;  %v2343_v33 = vadd.f32 %v1497_v29, %v1496_v45  ;;  %v710_v50 = vmul.f32 %v2110_v15, %v396_v42  ;;  %v877_v35 = vadd.f32 %v845_v31, %v809_v58  ;;  %1436 = vst.msk [vmem:[%s2265_s8 + $0x14] sm:$0xf] %vm1430_vm1, %v1797_v28  ;;  %v644_v38 = vmul.f32 %v2107_v14, %v468_v59  ;;  %v470_v28 = vld [vmem:[#allocation2 + $0xe9] sm:$0xff] }
  0x67   : > { %v1602_v4 = vsel %vm242_vm0, %v1541_v30, 0.0  ;;  %v1244_v2 = vadd.f32 1.0, %v1925_v63  ;;  %v2351_v39 = vadd.f32 %v2209_v5, %v1080_v34  ;;  %v778_v45 = vmul.f32 %v2165_v10, %v432_v56 }
  0x68   : > { %v2353_v47 = vadd.f32 %v1602_v4, %v1601_v49  ;;  %v945_v37 = vadd.f32 %v913_v8, %v877_v35  ;;  %v981_v27 = vmul.f32 %v2180_v32, %v433_v43  ;;  %v846_v21 = vmul.f32 %v2170_v22, %v468_v59  ;;  %v434_v59 = vld [vmem:[#allocation2 + $0xe8] sm:$0xff] }
  0x69   : > { %v1276_v42 = vmul.f32 %v1244_v2, %v1148_v24  ;;  %v1182_v40 = vmul.f32 0.70710677, %v2351_v39  ;;  %v509_v36 = vmul.f32 %v2101_v12, %v397_v23  ;;  %v577_v52 = vmul.f32 %v2104_v13, %v433_v43 }
  0x6a   : > { %v1013_v54 = vadd.f32 %v981_v27, %v945_v37  ;;  %v1049_v49 = vmul.f32 %v2192_v3, %v469_v48  ;;  %v742_v51 = vadd.f32 %v710_v50, %v674_v19  ;;  %v711_v6 = vmul.f32 %v2110_v15, %v397_v23 }
  0x6b   : > { %v1798_v46 = vpack.c.bf16 %v1276_v42, %v1276_v42  ;;  %v1468_v56 = vsel %vm242_vm0, %v1276_v42, 0.0  ;;  %v1542_v60 = vmul.f32 %v1276_v42, %v1276_v42  ;;  %1928 = verf.f32 %v1182_v40 }
  0x6c   : > { %v2363_v61 = vadd.f32 %v1468_v56, %v1467_v55  ;;  %v1081_v53 = vadd.f32 %v1049_v49, %v1013_v54  ;;  %v810_v9 = vadd.f32 %v778_v45, %v742_v51  ;;  %v676_v16 = vadd.f32 %v644_v38, %v608_v44  ;;  %v435_v45 = vld [vmem:[#allocation2 + $0xf0] sm:$0xff] }
  0x6d   : > { %1437 = vst.msk [vmem:[%s2265_s8 + $0x18] sm:$0xf] %vm1430_vm1, %v1798_v46  ;;  %v1573_v11 = vsel %vm242_vm0, %v1542_v60, 0.0  ;;  %v779_v31 = vmul.f32 %v2165_v10, %v433_v43  ;;  %v914_v17 = vmul.f32 %v2173_v25, %v398_v7  ;;  %v982_v19 = vmul.f32 %v2180_v32, %v434_v59  ;;  %v471_v60 = vld [vmem:[#allocation2 + $0xf1] sm:$0xff] }
  0x6e   : > { %v1927_v1 = vpop.eup %1926  ;;  %v2371_v18 = vadd.f32 %v1573_v11, %v1572_v0  ;;  %v2374_v55 = vadd.f32 %v2209_v5, %v1081_v53  ;;  %v878_v62 = vadd.f32 %v846_v21, %v810_v9  ;;  %v1149_v57 = vmul.f32 0.5, %v2317_v41  ;;  %v399_v41 = vld [vmem:[#allocation2 + $0xef] sm:$0xff] }
  0x6f   : > { %v1245_v20 = vadd.f32 1.0, %v1927_v1  ;;  %v609_v23 = vadd.f32 %v577_v52, %v509_v36  ;;  %v645_v24 = vmul.f32 %v2107_v14, %v469_v48  ;;  %v847_v58 = vmul.f32 %v2170_v22, %v469_v48 }
  0x70   : > { %v1183_v8 = vmul.f32 0.70710677, %v2374_v55  ;;  %v946_v29 = vadd.f32 %v914_v17, %v878_v62  ;;  %v743_v0 = vadd.f32 %v711_v6, %v675_v26  ;;  %v510_v34 = vmul.f32 %v2101_v12, %v398_v7 }
  0x71   : > { %v1277_v30 = vmul.f32 %v1245_v20, %v1149_v57  ;;  %v578_v63 = vmul.f32 %v2104_v13, %v434_v59  ;;  %v1050_v44 = vmul.f32 %v2192_v3, %v470_v28  ;;  %v915_v4 = vmul.f32 %v2173_v25, %v399_v41  ;;  %v436_v57 = vld [vmem:[#allocation2 + $0x108] sm:$0xff] }
  0x72   : > { %1930 = verf.f32 %v1183_v8  ;;  %v1014_v50 = vadd.f32 %v982_v19, %v946_v29  ;;  %v811_v35 = vadd.f32 %v779_v31, %v743_v0  ;;  %v712_v26 = vmul.f32 %v2110_v15, %v398_v7  ;;  %v400_v31 = vld [vmem:[#allocation2 + $0x107] sm:$0xff] }
  0x73   : > { %v1799_v2 = vpack.c.bf16 %v1277_v30, %v1277_v30  ;;  %v1499_v38 = vsel %vm242_vm0, %v1277_v30, 0.0  ;;  %v1543_v43 = vmul.f32 %v1277_v30, %v1277_v30  ;;  %v983_v21 = vmul.f32 %v2180_v32, %v435_v45 }
  0x74   : > { %v2388_v37 = vadd.f32 %v1499_v38, %v2343_v33  ;;  %v1082_v27 = vadd.f32 %v1050_v44, %v1014_v50  ;;  %v879_v42 = vadd.f32 %v847_v58, %v811_v35  ;;  %v610_v48 = vadd.f32 %v578_v63, %v510_v34 }
  0x75   : > { %1438 = vst.msk [vmem:[%s2265_s8 + $0x1c] sm:$0xf] %vm1430_vm1, %v1799_v2  ;;  %v1604_v40 = vsel %vm242_vm0, %v1543_v43, 0.0  ;;  %v646_v36 = vmul.f32 %v2107_v14, %v470_v28  ;;  %v780_v52 = vmul.f32 %v2165_v10, %v434_v59  ;;  %v1150_v51 = vmul.f32 0.5, %v2351_v39 }
  0x76   : > { %v2397_v54 = vadd.f32 %v1604_v40, %v2353_v47  ;;  %v2400_v49 = vadd.f32 %v2209_v5, %v1082_v27  ;;  %v947_v33 = vadd.f32 %v915_v4, %v879_v42  ;;  %v677_v46 = vadd.f32 %v645_v24, %v609_v23  ;;  %v472_v24 = vld [vmem:[#allocation2 + $0x109] sm:$0xff] }
  0x77   : > { %v848_v56 = vmul.f32 %v2170_v22, %v470_v28  ;;  %v744_v6 = vadd.f32 %v712_v26, %v676_v16  ;;  %v713_v9 = vmul.f32 %v2110_v15, %v399_v41  ;;  %v1051_v47 = vmul.f32 %v2192_v3, %v471_v60  ;;  %v401_v40 = vld [vmem:[#allocation2 + $0x10f] sm:$0xff] }
  0x78   : > { %v1929_v53 = vpop.eup %1928  ;;  %v1184_v7 = vmul.f32 0.70710677, %v2400_v49  ;;  %v1015_v11 = vadd.f32 %v983_v21, %v947_v33  ;;  %v678_v17 = vadd.f32 %v646_v36, %v610_v48  ;;  %v916_v62 = vmul.f32 %v2173_v25, %v400_v31 }
  0x79   : > { %v1246_v59 = vadd.f32 1.0, %v1929_v53  ;;  %v812_v1 = vadd.f32 %v780_v52, %v744_v6  ;;  %v511_v39 = vmul.f32 %v2101_v12, %v399_v41  ;;  %v579_v19 = vmul.f32 %v2104_v13, %v435_v45  ;;  %v437_v52 = vld [vmem:[#allocation2 + $0x110] sm:$0xff] }
  0x7a   : > { %1932 = verf.f32 %v1184_v7  ;;  %v1083_v16 = vadd.f32 %v1051_v47, %v1015_v11  ;;  %v781_v23 = vmul.f32 %v2165_v10, %v435_v45  ;;  %v984_v8 = vmul.f32 %v2180_v32, %v436_v57  ;;  %v473_v6 = vld [vmem:[#allocation2 + $0x111] sm:$0xff] }
  0x7b   : > { %v1278_v20 = vmul.f32 %v1246_v59, %v1150_v51  ;;  %v880_v58 = vadd.f32 %v848_v56, %v812_v1  ;;  %v849_v28 = vmul.f32 %v2170_v22, %v471_v60  ;;  %v1052_v0 = vmul.f32 %v2192_v3, %v472_v24 }
  0x7c   : > { %v1121_v29 = vadd.f32 %v2209_v5, %v1083_v16  ;;  %v745_v30 = vadd.f32 %v713_v9, %v677_v46  ;;  %v647_v35 = vmul.f32 %v2107_v14, %v471_v60  ;;  %v512_v2 = vmul.f32 %v2101_v12, %v400_v31 }
  0x7d   : > { %v1800_v34 = vpack.c.bf16 %v1278_v20, %v1278_v20  ;;  %v1470_v63 = vsel %vm242_vm0, %v1278_v20, 0.0  ;;  %v1544_v44 = vmul.f32 %v1278_v20, %v1278_v20  ;;  %v948_v41 = vadd.f32 %v916_v62, %v880_v58 }
  0x7e   : > { %v2417_v50 = vadd.f32 %v1470_v63, %v2363_v61  ;;  %v1185_v4 = vmul.f32 0.70710677, %v1121_v29  ;;  %v580_v26 = vmul.f32 %v2104_v13, %v436_v57  ;;  %v813_v27 = vadd.f32 %v781_v23, %v745_v30 }
  0x7f   : > { %v1931_v38 = vpop.eup %1930  ;;  %1439 = vst.msk [vmem:[%s2265_s8 + $0x20] sm:$0xf] %vm1430_vm1, %v1800_v34  ;;  %v1575_v43 = vsel %vm242_vm0, %v1544_v44, 0.0  ;;  %v1016_v45 = vadd.f32 %v984_v8, %v948_v41  ;;  %v1151_v61 = vmul.f32 0.5, %v2374_v55  ;;  %v611_v48 = vadd.f32 %v579_v19, %v511_v39 }
  0x80   : > { %v2426_v42 = vadd.f32 %v1575_v43, %v2371_v18  ;;  %v1247_v21 = vadd.f32 1.0, %v1931_v38  ;;  %1934 = verf.f32 %v1185_v4  ;;  %v881_v33 = vadd.f32 %v849_v28, %v813_v27 }
  0x81   : > { %v1084_v36 = vadd.f32 %v1052_v0, %v1016_v45  ;;  %v917_v51 = vmul.f32 %v2173_v25, %v401_v40  ;;  %v648_v56 = vmul.f32 %v2107_v14, %v472_v24  ;;  %v714_v60 = vmul.f32 %v2110_v15, %v400_v31  ;;  %v402_v0 = vld [vmem:[#allocation2 + $0x127] sm:$0xff] }
  0x82   : > { %v1279_v46 = vmul.f32 %v1247_v21, %v1151_v61  ;;  %v985_v18 = vmul.f32 %v2180_v32, %v437_v52  ;;  %v612_v53 = vadd.f32 %v580_v26, %v512_v2  ;;  %v1053_v9 = vmul.f32 %v2192_v3, %v473_v6  ;;  %v474_v2 = vld [vmem:[#allocation2 + $0x129] sm:$0xff] }
  0x83   : > { %v2434_v55 = vadd.f32 %v2209_v5, %v1084_v36  ;;  %v949_v7 = vadd.f32 %v917_v51, %v881_v33  ;;  %v782_v1 = vmul.f32 %v2165_v10, %v436_v57  ;;  %v679_v31 = vadd.f32 %v647_v35, %v611_v48 }
  0x84   : > { %v1801_v11 = vpack.c.bf16 %v1279_v46, %v1279_v46  ;;  %v1501_v47 = vsel %vm242_vm0, %v1279_v46, 0.0  ;;  %v1545_v59 = vmul.f32 %v1279_v46, %v1279_v46  ;;  %v1152_v20 = vmul.f32 0.5, %v2400_v49 }
  0x85   : > { %v2440_v62 = vadd.f32 %v1501_v47, %v2388_v37  ;;  %v1186_v39 = vmul.f32 0.70710677, %v2434_v55  ;;  %v1017_v19 = vadd.f32 %v985_v18, %v949_v7  ;;  %v850_v23 = vmul.f32 %v2170_v22, %v472_v24  ;;  %v403_v18 = vld [vmem:[#allocation2 + $0x12f] sm:$0xff] }
  0x86   : > { %1440 = vst.msk [vmem:[%s2265_s8 + $0x24] sm:$0xf] %vm1430_vm1, %v1801_v11  ;;  %v1606_v16 = vsel %vm242_vm0, %v1545_v59, 0.0  ;;  %v746_v58 = vadd.f32 %v714_v60, %v678_v17  ;;  %v715_v37 = vmul.f32 %v2110_v15, %v401_v40  ;;  %v680_v34 = vadd.f32 %v648_v56, %v612_v53 }
  0x87   : > { %v1933_v8 = vpop.eup %1932  ;;  %v2449_v28 = vadd.f32 %v1606_v16, %v2397_v54  ;;  %1936 = verf.f32 %v1186_v39  ;;  %v1085_v57 = vadd.f32 %v1053_v9, %v1017_v19  ;;  %v918_v44 = vmul.f32 %v2173_v25, %v402_v0  ;;  %v438_v54 = vld [vmem:[#allocation2 + $0x128] sm:$0xff] }
  0x88   : > { %v1248_v30 = vadd.f32 1.0, %v1933_v8  ;;  %v814_v63 = vadd.f32 %v782_v1, %v746_v58  ;;  %v1153_v41 = vmul.f32 0.5, %v1121_v29  ;;  %v513_v49 = vmul.f32 %v2101_v12, %v401_v40 }
  0x89   : > { %v581_v24 = vmul.f32 %v2104_v13, %v437_v52  ;;  %v2456_v17 = vadd.f32 %v2209_v5, %v1085_v57  ;;  %v783_v4 = vmul.f32 %v2165_v10, %v437_v52  ;;  %v986_v43 = vmul.f32 %v2180_v32, %v438_v54 }
  0x8a   : > { %v1280_v35 = vmul.f32 %v1248_v30, %v1152_v20  ;;  %v882_v38 = vadd.f32 %v850_v23, %v814_v63  ;;  %v851_v26 = vmul.f32 %v2170_v22, %v473_v6  ;;  %v1054_v45 = vmul.f32 %v2192_v3, %v474_v2 }
  0x8b   : > { %v1187_v29 = vmul.f32 0.70710677, %v2456_v17  ;;  %v747_v27 = vadd.f32 %v715_v37, %v679_v31  ;;  %v514_v33 = vmul.f32 %v2101_v12, %v402_v0  ;;  %v582_v51 = vmul.f32 %v2104_v13, %v438_v54  ;;  %v439_v31 = vld [vmem:[#allocation2 + $0x130] sm:$0xff] }
  0x8c   : > { %v1802_v61 = vpack.c.bf16 %v1280_v35, %v1280_v35  ;;  %v1472_v21 = vsel %vm242_vm0, %v1280_v35, 0.0  ;;  %v1546_v40 = vmul.f32 %v1280_v35, %v1280_v35  ;;  %v950_v48 = vadd.f32 %v918_v44, %v882_v38  ;;  %v475_v37 = vld [vmem:[#allocation2 + $0x131] sm:$0xff] }
  0x8d   : > { %v1935_v36 = vpop.eup %1934  ;;  %v1473_v52 = vadd.f32 %v1472_v21, %v2417_v50  ;;  %1938 = verf.f32 %v1187_v29  ;;  %v815_v53 = vadd.f32 %v783_v4, %v747_v27  ;;  %v613_v9 = vadd.f32 %v581_v24, %v513_v49 }
  0x8e   : > { %1441 = vst.msk [vmem:[%s2265_s8 + $0x28] sm:$0xf] %vm1430_vm1, %v1802_v61  ;;  %v1577_v46 = vsel %vm242_vm0, %v1546_v40, 0.0  ;;  %v1249_v56 = vadd.f32 1.0, %v1935_v36  ;;  %v1018_v60 = vadd.f32 %v986_v43, %v950_v48  ;;  %v649_v11 = vmul.f32 %v2107_v14, %v473_v6  ;;  %v440_v61 = vld [vmem:[#allocation2 + $0x148] sm:$0xff] }
  0x8f   : > { %v1578_v7 = vadd.f32 %v1577_v46, %v2426_v42  ;;  %v919_v50 = vmul.f32 %v2173_v25, %v403_v18  ;;  %v716_v59 = vmul.f32 %v2110_v15, %v402_v0  ;;  %v883_v39 = vadd.f32 %v851_v26, %v815_v53  ;;  %v404_v26 = vld [vmem:[#allocation2 + $0x147] sm:$0xff] }
  0x90   : > { %v1281_v47 = vmul.f32 %v1249_v56, %v1153_v41  ;;  %v1086_v1 = vadd.f32 %v1054_v45, %v1018_v60  ;;  %v614_v19 = vadd.f32 %v582_v51, %v514_v33  ;;  %v650_v16 = vmul.f32 %v2107_v14, %v474_v2  ;;  %v476_v46 = vld [vmem:[#allocation2 + $0x149] sm:$0xff] }
  0x91   : > { %v784_v20 = vmul.f32 %v2165_v10, %v438_v54  ;;  %v987_v23 = vmul.f32 %v2180_v32, %v439_v31  ;;  %v681_v0 = vadd.f32 %v649_v11, %v613_v9  ;;  %v951_v30 = vadd.f32 %v919_v50, %v883_v39 }
  0x92   : > { %v1803_v42 = vpack.c.bf16 %v1281_v47, %v1281_v47  ;;  %v1503_v58 = vsel %vm242_vm0, %v1281_v47, 0.0  ;;  %v1547_v6 = vmul.f32 %v1281_v47, %v1281_v47  ;;  %v2479_v8 = vadd.f32 %v2209_v5, %v1086_v1 }
  0x93   : > { %v1504_v57 = vadd.f32 %v1503_v58, %v2440_v62  ;;  %v1055_v63 = vmul.f32 %v2192_v3, %v475_v37  ;;  %v852_v49 = vmul.f32 %v2170_v22, %v474_v2  ;;  %v748_v54 = vadd.f32 %v716_v59, %v680_v34 }
  0x94   : > { %v1937_v44 = vpop.eup %1936  ;;  %1442 = vst.msk [vmem:[%s2265_s8 + $0x2c] sm:$0xf] %vm1430_vm1, %v1803_v42  ;;  %v1608_v41 = vsel %vm242_vm0, %v1547_v6, 0.0  ;;  %v1188_v24 = vmul.f32 0.70710677, %v2479_v8  ;;  %v1154_v4 = vmul.f32 0.5, %v2434_v55  ;;  %v1019_v62 = vadd.f32 %v987_v23, %v951_v30 }
  0x95   : > { %v1609_v35 = vadd.f32 %v1608_v41, %v2449_v28  ;;  %v1250_v38 = vadd.f32 1.0, %v1937_v44  ;;  %v2490_v43 = vadd.f32 %v650_v16, %v614_v19  ;;  %v515_v3 = vmul.f32 %v2101_v12, %v403_v18  ;;  %v441_v44 = vld [vmem:[#allocation2 + $0x150] sm:$0xff] }
  0x96   : > { %1940 = verf.f32 %v1188_v24  ;;  %v816_v29 = vadd.f32 %v784_v20, %v748_v54  ;;  %v583_v27 = vmul.f32 %v2104_v13, %v439_v31  ;;  %v1087_v2 = vadd.f32 %v1055_v63, %v1019_v62  ;;  %v405_v20 = vld [vmem:[#allocation2 + $0x14f] sm:$0xff] }
  0x97   : > { %v1282_v45 = vmul.f32 %v1250_v38, %v1154_v4  ;;  %v920_v34 = vmul.f32 %v2173_v25, %v404_v26  ;;  %v651_v28 = vmul.f32 %v2107_v14, %v475_v37  ;;  %v717_v55 = vmul.f32 %v2110_v15, %v403_v18  ;;  %v2508_v18 = vld [vmem:[%s2890_s1 + $0x8] ss:$0 sm:$0xff] }
  0x98   : > { %v884_v21 = vadd.f32 %v852_v49, %v816_v29  ;;  %v988_v40 = vmul.f32 %v2180_v32, %v440_v61  ;;  %v2500_v51 = vadd.f32 %v2209_v5, %v1087_v2  ;;  %v1155_v53 = vmul.f32 0.5, %v2456_v17  ;;  %v477_v29 = vld [vmem:[#allocation2 + $0x151] sm:$0xff] }
  0x99   : > { %v1804_v48 = vpack.c.bf16 %v1282_v45, %v1282_v45  ;;  %v1474_v36 = vsel %vm242_vm0, %v1282_v45, 0.0  ;;  %v1548_v33 = vmul.f32 %v1282_v45, %v1282_v45  ;;  %v1056_v11 = vmul.f32 %v2508_v18, %v476_v46 }
  0x9a   : > { %v1939_v56 = vpop.eup %1938  ;;  %v2502_v60 = vadd.f32 %v1474_v36, %v1473_v52  ;;  %v952_v9 = vadd.f32 %v920_v34, %v884_v21  ;;  %v785_v47 = vmul.f32 %v2165_v10, %v439_v31  ;;  %v1189_v52 = vmul.f32 0.70710677, %v2500_v51  ;;  %v406_v36 = vld [vmem:[#allocation2 + $0x167] sm:$0xff] }
  0x9b   : > { %1443 = vst.msk [vmem:[%s2265_s8 + $0x30] sm:$0xf] %vm1430_vm1, %v1804_v48  ;;  %v1579_v50 = vsel %vm242_vm0, %v1548_v33, 0.0  ;;  %v1251_v5 = vadd.f32 1.0, %v1939_v56  ;;  %v516_v17 = vmul.f32 %v2101_v12, %v404_v26  ;;  %v584_v1 = vmul.f32 %v2104_v13, %v440_v61 }
  0x9c   : > { %v2516_v59 = vadd.f32 %v1579_v50, %v1578_v7  ;;  %v1020_v39 = vadd.f32 %v988_v40, %v952_v9  ;;  %v853_v16 = vmul.f32 %v2170_v22, %v475_v37  ;;  %1942 = verf.f32 %v1189_v52 }
  0x9d   : > { %v1283_v19 = vmul.f32 %v1251_v5, %v1155_v53  ;;  %v749_v23 = vadd.f32 %v717_v55, %v681_v0  ;;  %v615_v42 = vadd.f32 %v583_v27, %v515_v3  ;;  %v718_v58 = vmul.f32 %v2110_v15, %v404_v26  ;;  %v2530_v0 = vld [vmem:[%s2891_s2] ss:$0 sm:$0xff] }
  0x9e   : > { %v1088_v31 = vadd.f32 %v1056_v11, %v1020_v39  ;;  %v921_v6 = vmul.f32 %v2173_v25, %v405_v20  ;;  %v616_v24 = vadd.f32 %v584_v1, %v516_v17  ;;  %v652_v37 = vmul.f32 %v2107_v14, %v476_v46 }
  0x9f   : > { %v1805_v7 = vpack.c.bf16 %v1283_v19, %v1283_v19  ;;  %v1505_v30 = vsel %vm242_vm0, %v1283_v19, 0.0  ;;  %v1549_v63 = vmul.f32 %v1283_v19, %v1283_v19  ;;  %v817_v41 = vadd.f32 %v785_v47, %v749_v23  ;;  %v478_v23 = vld [vmem:[#allocation2 + $0x169] sm:$0xff] }
  0xa0   : > { %v2524_v49 = vadd.f32 %v1505_v30, %v1504_v57  ;;  %v2533_v54 = vadd.f32 %v2530_v0, %v1088_v31  ;;  %v786_v38 = vmul.f32 %v2165_v10, %v440_v61  ;;  %v989_v57 = vmul.f32 %v2180_v32, %v441_v44 }
  0xa1   : > { %1444 = vst.msk [vmem:[%s2265_s8 + $0x34] sm:$0xf] %vm1430_vm1, %v1805_v7  ;;  %v1610_v4 = vsel %vm242_vm0, %v1549_v63, 0.0  ;;  %v885_v62 = vadd.f32 %v853_v16, %v817_v41  ;;  %v517_v45 = vmul.f32 %v2101_v12, %v405_v20  ;;  %v585_v27 = vmul.f32 %v2104_v13, %v441_v44 }
  0xa2   : > { %v2540_v3 = vadd.f32 %v1610_v4, %v1609_v35  ;;  %v1190_v26 = vmul.f32 0.70710677, %v2533_v54  ;;  %v854_v34 = vmul.f32 %v2170_v22, %v476_v46  ;;  %v1057_v21 = vmul.f32 %v2508_v18, %v477_v29 }
  0xa3   : > { %v1941_v2 = vpop.eup %1940  ;;  %v953_v55 = vadd.f32 %v921_v6, %v885_v62  ;;  %v750_v61 = vadd.f32 %v718_v58, %v2490_v43  ;;  %v1156_v40 = vmul.f32 0.5, %v2479_v8  ;;  %v683_v35 = vadd.f32 %v651_v28, %v615_v42  ;;  %v442_v28 = vld [vmem:[#allocation2 + $0x168] sm:$0xff] }
  0xa4   : > { %v1252_v48 = vadd.f32 1.0, %v1941_v2  ;;  %1944 = verf.f32 %v1190_v26  ;;  %v719_v33 = vmul.f32 %v2110_v15, %v405_v20  ;;  %v922_v9 = vmul.f32 %v2173_v25, %v406_v36  ;;  %v443_v2 = vld [vmem:[#allocation2 + $0x170] sm:$0xff] }
  0xa5   : > { %v1021_v56 = vadd.f32 %v989_v57, %v953_v55  ;;  %v818_v53 = vadd.f32 %v786_v38, %v750_v61  ;;  %v684_v50 = vadd.f32 %v652_v37, %v616_v24  ;;  %v617_v46 = vadd.f32 %v585_v27, %v517_v45  ;;  %v407_v37 = vld [vmem:[#allocation2 + $0x16f] sm:$0xff] }
  0xa6   : > { %v1284_v11 = vmul.f32 %v1252_v48, %v1156_v40  ;;  %v653_v5 = vmul.f32 %v2107_v14, %v477_v29  ;;  %v787_v43 = vmul.f32 %v2165_v10, %v441_v44  ;;  %v855_v8 = vmul.f32 %v2170_v22, %v477_v29 }
  0xa7   : > { %v1089_v47 = vadd.f32 %v1057_v21, %v1021_v56  ;;  %v886_v52 = vadd.f32 %v854_v34, %v818_v53  ;;  %v990_v19 = vmul.f32 %v2180_v32, %v442_v28  ;;  %v751_v58 = vadd.f32 %v719_v33, %v683_v35  ;;  %v479_v33 = vld [vmem:[#allocation2 + $0x171] sm:$0xff] }
  0xa8   : > { %v1806_v17 = vpack.c.bf16 %v1284_v11, %v1284_v11  ;;  %v1476_v1 = vsel %vm242_vm0, %v1284_v11, 0.0  ;;  %v1550_v39 = vmul.f32 %v1284_v11, %v1284_v11  ;;  %v518_v7 = vmul.f32 %v2101_v12, %v406_v36 }
  0xa9   : > { %v2557_v16 = vadd.f32 %v1476_v1, %v2502_v60  ;;  %v2560_v20 = vadd.f32 %v2530_v0, %v1089_v47  ;;  %v954_v42 = vadd.f32 %v922_v9, %v886_v52  ;;  %v1943_v31 = vpop.eup %1942  ;;  %v586_v30 = vmul.f32 %v2104_v13, %v442_v28  ;;  %v408_v47 = vld [vmem:[#allocation2 + $0x187] sm:$0xff] }
  0xaa   : > { %1445 = vst.msk [vmem:[%s2265_s8 + $0x38] sm:$0xf] %vm1430_vm1, %v1806_v17  ;;  %v1581_v6 = vsel %vm242_vm0, %v1550_v39, 0.0  ;;  %v1058_v63 = vmul.f32 %v2508_v18, %v478_v23  ;;  %v1157_v44 = vmul.f32 0.5, %v2500_v51  ;;  %v1253_v41 = vadd.f32 1.0, %v1943_v31 }
  0xab   : > { %v2569_v60 = vadd.f32 %v1581_v6, %v2516_v59  ;;  %v1191_v24 = vmul.f32 0.70710677, %v2560_v20  ;;  %v685_v4 = vadd.f32 %v653_v5, %v617_v46  ;;  %v1022_v38 = vadd.f32 %v990_v19, %v954_v42 }
  0xac   : > { %v819_v62 = vadd.f32 %v787_v43, %v751_v58  ;;  %v923_v57 = vmul.f32 %v2173_v25, %v407_v37  ;;  %v1285_v26 = vmul.f32 %v1253_v41, %v1157_v44  ;;  %v654_v29 = vmul.f32 %v2107_v14, %v478_v23  ;;  %v480_v44 = vld [vmem:[#allocation2 + $0x189] sm:$0xff] }
  0xad   : > { %1946 = verf.f32 %v1191_v24  ;;  %v720_v45 = vmul.f32 %v2110_v15, %v406_v36  ;;  %v618_v59 = vadd.f32 %v586_v30, %v518_v7  ;;  %v788_v27 = vmul.f32 %v2165_v10, %v442_v28 }
  0xae   : > { %v1090_v51 = vadd.f32 %v1058_v63, %v1022_v38  ;;  %v887_v34 = vadd.f32 %v855_v8, %v819_v62  ;;  %v1807_v55 = vpack.c.bf16 %v1285_v26, %v1285_v26  ;;  %v1507_v21 = vsel %vm242_vm0, %v1285_v26, 0.0 }
  0xaf   : > { %v1551_v61 = vmul.f32 %v1285_v26, %v1285_v26  ;;  %v991_v40 = vmul.f32 %v2180_v32, %v443_v2  ;;  %v2580_v48 = vadd.f32 %v1507_v21, %v2524_v49  ;;  %v1158_v35 = vmul.f32 0.5, %v2533_v54 }
  0xb0   : > { %v2584_v36 = vadd.f32 %v2530_v0, %v1090_v51  ;;  %v955_v56 = vadd.f32 %v923_v57, %v887_v34  ;;  %1446 = vst.msk [vmem:[%s2265_s8 + $0x3c] sm:$0xf] %vm1430_vm1, %v1807_v55  ;;  %v856_v11 = vmul.f32 %v2170_v22, %v478_v23  ;;  %v1059_v46 = vmul.f32 %v2508_v18, %v479_v33  ;;  %v409_v51 = vld [vmem:[#allocation2 + $0x18f] sm:$0xff] }
  0xb1   : > { %v1945_v53 = vpop.eup %1944  ;;  %v1612_v9 = vsel %vm242_vm0, %v1551_v61, 0.0  ;;  %v752_v5 = vadd.f32 %v720_v45, %v684_v50  ;;  %v686_v54 = vadd.f32 %v654_v29, %v618_v59  ;;  %v519_v28 = vmul.f32 %v2101_v12, %v407_v37 }
  0xb2   : > { %v2592_v49 = vadd.f32 %v1612_v9, %v2540_v3  ;;  %v1254_v43 = vadd.f32 1.0, %v1945_v53  ;;  %v1192_v8 = vmul.f32 0.70710677, %v2584_v36  ;;  %v1023_v52 = vadd.f32 %v991_v40, %v955_v56  ;;  %v444_v3 = vld [vmem:[#allocation2 + $0x188] sm:$0xff] }
  0xb3   : > { %v820_v17 = vadd.f32 %v788_v27, %v752_v5  ;;  %v924_v1 = vmul.f32 %v2173_v25, %v408_v47  ;;  %v587_v19 = vmul.f32 %v2104_v13, %v443_v2  ;;  %v721_v50 = vmul.f32 %v2110_v15, %v407_v37 }
  0xb4   : > { %v1286_v39 = vmul.f32 %v1254_v43, %v1158_v35  ;;  %1948 = verf.f32 %v1192_v8  ;;  %v655_v23 = vmul.f32 %v2107_v14, %v479_v33  ;;  %v1091_v42 = vadd.f32 %v1059_v46, %v1023_v52  ;;  %v445_v35 = vld [vmem:[#allocation2 + $0x190] sm:$0xff] }
  0xb5   : > { %v888_v58 = vadd.f32 %v856_v11, %v820_v17  ;;  %v992_v31 = vmul.f32 %v2180_v32, %v444_v3  ;;  %v789_v63 = vmul.f32 %v2165_v10, %v443_v2  ;;  %v1060_v38 = vmul.f32 %v2508_v18, %v480_v44  ;;  %v481_v43 = vld [vmem:[#allocation2 + $0x191] sm:$0xff] }
  0xb6   : > { %v1808_v6 = vpack.c.bf16 %v1286_v39, %v1286_v39  ;;  %v1478_v7 = vsel %vm242_vm0, %v1286_v39, 0.0  ;;  %v1552_v30 = vmul.f32 %v1286_v39, %v1286_v39  ;;  %v2607_v24 = vadd.f32 %v2530_v0, %v1091_v42  ;;  %v410_v42 = vld [vmem:[#allocation2 + $0x1a7] sm:$0xff] }
  0xb7   : > { %v2604_v41 = vadd.f32 %v1478_v7, %v2557_v16  ;;  %v956_v37 = vadd.f32 %v924_v1, %v888_v58  ;;  %v619_v57 = vadd.f32 %v587_v19, %v519_v28  ;;  %v857_v26 = vmul.f32 %v2170_v22, %v479_v33 }
  0xb8   : > { %1447 = vst.msk [vmem:[%s2265_s8 + $0x40] sm:$0xf] %vm1430_vm1, %v1808_v6  ;;  %v1583_v62 = vsel %vm242_vm0, %v1552_v30, 0.0  ;;  %v753_v29 = vadd.f32 %v721_v50, %v685_v4  ;;  %v1193_v16 = vmul.f32 0.70710677, %v2607_v24  ;;  %v520_v59 = vmul.f32 %v2101_v12, %v408_v47 }
  0xb9   : > { %v2615_v45 = vadd.f32 %v1583_v62, %v2569_v60  ;;  %v1024_v27 = vadd.f32 %v992_v31, %v956_v37  ;;  %v588_v34 = vmul.f32 %v2104_v13, %v444_v3  ;;  %v722_v55 = vmul.f32 %v2110_v15, %v408_v47 }
  0xba   : > { %v1947_v2 = vpop.eup %1946  ;;  %v821_v21 = vadd.f32 %v789_v63, %v753_v29  ;;  %v925_v61 = vmul.f32 %v2173_v25, %v409_v51  ;;  %v1159_v40 = vmul.f32 0.5, %v2560_v20  ;;  %1950 = verf.f32 %v1193_v16  ;;  %v2649_v16 = vld [vmem:[#allocation2 + $0x1a9] sm:$0xff] }
  0xbb   : > { %v1255_v4 = vadd.f32 1.0, %v1947_v2  ;;  %v1092_v60 = vadd.f32 %v1060_v38, %v1024_v27  ;;  %v687_v33 = vadd.f32 %v655_v23, %v619_v57  ;;  %v993_v53 = vmul.f32 %v2180_v32, %v445_v35 }
  0xbc   : > { %v889_v56 = vadd.f32 %v857_v26, %v821_v21  ;;  %v656_v11 = vmul.f32 %v2107_v14, %v480_v44  ;;  %v790_v46 = vmul.f32 %v2165_v10, %v444_v3  ;;  %v620_v8 = vadd.f32 %v588_v34, %v520_v59 }
  0xbd   : > { %v1287_v9 = vmul.f32 %v1255_v4, %v1159_v40  ;;  %v2627_v5 = vadd.f32 %v2530_v0, %v1092_v60  ;;  %v1061_v47 = vmul.f32 %v2508_v18, %v481_v43  ;;  %v754_v28 = vadd.f32 %v722_v55, %v686_v54 }
  0xbe   : > { %v957_v20 = vadd.f32 %v925_v61, %v889_v56  ;;  %v858_v39 = vmul.f32 %v2170_v22, %v480_v44  ;;  %v1160_v50 = vmul.f32 0.5, %v2584_v36  ;;  %v723_v31 = vmul.f32 %v2110_v15, %v409_v51  ;;  %v446_v36 = vld [vmem:[#allocation2 + $0x1a8] sm:$0xff] }
  0xbf   : > { %v1809_v52 = vpack.c.bf16 %v1287_v9, %v1287_v9  ;;  %v1509_v17 = vsel %vm242_vm0, %v1287_v9, 0.0  ;;  %v1553_v1 = vmul.f32 %v1287_v9, %v1287_v9  ;;  %v1194_v3 = vmul.f32 0.70710677, %v2627_v5 }
  0xc0   : > { %v2633_v19 = vadd.f32 %v1509_v17, %v2580_v48  ;;  %v1025_v23 = vadd.f32 %v993_v53, %v957_v20  ;;  %v822_v6 = vadd.f32 %v790_v46, %v754_v28  ;;  %v926_v7 = vmul.f32 %v2173_v25, %v410_v42 }
  0xc1   : > { %v1949_v58 = vpop.eup %1948  ;;  %1448 = vst.msk [vmem:[%s2265_s8 + $0x44] sm:$0xf] %vm1430_vm1, %v1809_v52  ;;  %v1614_v54 = vsel %vm242_vm0, %v1553_v1, 0.0  ;;  %1952 = verf.f32 %v1194_v3  ;;  %v688_v44 = vadd.f32 %v656_v11, %v620_v8  ;;  %v994_v38 = vmul.f32 %v2180_v32, %v446_v36  ;;  %v447_v8 = vld [vmem:[#allocation2 + $0x1b0] sm:$0xff] }
  0xc2   : > { %v1615_v30 = vadd.f32 %v1614_v54, %v2592_v49  ;;  %v1256_v48 = vadd.f32 1.0, %v1949_v58  ;;  %v1093_v63 = vadd.f32 %v1061_v47, %v1025_v23  ;;  %v890_v37 = vadd.f32 %v858_v39, %v822_v6  ;;  %v483_v39 = vld [vmem:[#allocation2 + $0x1b1] sm:$0xff] }
  0xc3   : > { %v521_v57 = vmul.f32 %v2101_v12, %v409_v51  ;;  %v791_v26 = vmul.f32 %v2165_v10, %v445_v35  ;;  %v589_v49 = vmul.f32 %v2104_v13, %v445_v35  ;;  %v1062_v27 = vmul.f32 %v2508_v18, %v2649_v16  ;;  %v411_v35 = vld [vmem:[#allocation2 + $0x1af] sm:$0xff] }
  0xc4   : > { %v1288_v62 = vmul.f32 %v1256_v48, %v1160_v50  ;;  %v2647_v29 = vadd.f32 %v2530_v0, %v1093_v63  ;;  %v958_v59 = vadd.f32 %v926_v7, %v890_v37  ;;  %v755_v2 = vadd.f32 %v723_v31, %v687_v33 }
  0xc5   : > { %v859_v51 = vmul.f32 %v2170_v22, %v481_v43  ;;  %v1161_v40 = vmul.f32 0.5, %v2607_v24  ;;  %v724_v53 = vmul.f32 %v2110_v15, %v410_v42  ;;  %v927_v11 = vmul.f32 %v2173_v25, %v411_v35 }
  0xc6   : > { %v1810_v34 = vpack.c.bf16 %v1288_v62, %v1288_v62  ;;  %v1480_v55 = vsel %vm242_vm0, %v1288_v62, 0.0  ;;  %v1554_v21 = vmul.f32 %v1288_v62, %v1288_v62  ;;  %v1195_v4 = vmul.f32 0.70710677, %v2647_v29 }
  0xc7   : > { %v2657_v61 = vadd.f32 %v1480_v55, %v2604_v41  ;;  %v1026_v60 = vadd.f32 %v994_v38, %v958_v59  ;;  %v1951_v56 = vpop.eup %1950  ;;  %v823_v9 = vadd.f32 %v791_v26, %v755_v2  ;;  %v995_v47 = vmul.f32 %v2180_v32, %v447_v8  ;;  %v412_v59 = vld [vmem:[#allocation2 + $0x1c7] sm:$0xff] }
  0xc8   : > { %1449 = vst.msk [vmem:[%s2265_s8 + $0x48] sm:$0xf] %vm1430_vm1, %v1810_v34  ;;  %v1585_v33 = vsel %vm242_vm0, %v1554_v21, 0.0  ;;  %v1257_v41 = vadd.f32 1.0, %v1951_v56  ;;  %1954 = verf.f32 %v1195_v4  ;;  %v657_v52 = vmul.f32 %v2107_v14, %v481_v43 }
  0xc9   : > { %v2667_v46 = vadd.f32 %v1585_v33, %v2615_v45  ;;  %v1094_v24 = vadd.f32 %v1062_v27, %v1026_v60  ;;  %v891_v20 = vadd.f32 %v859_v51, %v823_v9  ;;  %v792_v17 = vmul.f32 %v2165_v10, %v446_v36 }
  0xca   : > { %v1289_v28 = vmul.f32 %v1257_v41, %v1161_v40  ;;  %v621_v50 = vadd.f32 %v589_v49, %v521_v57  ;;  %v1063_v3 = vmul.f32 %v2508_v18, %v483_v39  ;;  %v756_v23 = vadd.f32 %v724_v53, %v688_v44 }
  0xcb   : > { %v2673_v1 = vadd.f32 %v2530_v0, %v1094_v24  ;;  %v959_v45 = vadd.f32 %v927_v11, %v891_v20  ;;  %v860_v6 = vmul.f32 %v2170_v22, %v2649_v16  ;;  %v522_v7 = vmul.f32 %v2101_v12, %v410_v42  ;;  %v448_v42 = vld [vmem:[#allocation2 + $0x1c8] sm:$0xff] }
  0xcc   : > { %v1811_v58 = vpack.c.bf16 %v1289_v28, %v1289_v28  ;;  %v1511_v54 = vsel %vm242_vm0, %v1289_v28, 0.0  ;;  %v1555_v31 = vmul.f32 %v1289_v28, %v1289_v28  ;;  %v1162_v38 = vmul.f32 0.5, %v2627_v5 }
  0xcd   : > { %v2680_v43 = vadd.f32 %v1511_v54, %v2633_v19  ;;  %v1196_v48 = vmul.f32 0.70710677, %v2673_v1  ;;  %v1027_v63 = vadd.f32 %v995_v47, %v959_v45  ;;  %v590_v62 = vmul.f32 %v2104_v13, %v446_v36 }
  0xce   : > { %v1953_v37 = vpop.eup %1952  ;;  %1450 = vst.msk [vmem:[%s2265_s8 + $0x4c] sm:$0xf] %vm1430_vm1, %v1811_v58  ;;  %v1616_v44 = vsel %vm242_vm0, %v1555_v31, 0.0  ;;  %v824_v57 = vadd.f32 %v792_v17, %v756_v23  ;;  %v928_v2 = vmul.f32 %v2173_v25, %v412_v59  ;;  %v996_v34 = vmul.f32 %v2180_v32, %v448_v42 }
  0xcf   : > { %v2689_v26 = vadd.f32 %v1616_v44, %v1615_v30  ;;  %v1258_v49 = vadd.f32 1.0, %v1953_v37  ;;  %1956 = verf.f32 %v1196_v48  ;;  %v1095_v19 = vadd.f32 %v1063_v3, %v1027_v63  ;;  %v484_v30 = vld [vmem:[#allocation2 + $0x1c9] sm:$0xff] }
  0xd0   : > { %v892_v27 = vadd.f32 %v860_v6, %v824_v57  ;;  %v689_v21 = vadd.f32 %v657_v52, %v621_v50  ;;  %v725_v5 = vmul.f32 %v2110_v15, %v411_v35  ;;  %v1064_v40 = vmul.f32 %v2508_v18, %v484_v30  ;;  %v413_v50 = vld [vmem:[#allocation2 + $0x1cf] sm:$0xff] }
  0xd1   : > { %v2693_v55 = vmul.f32 %v1258_v49, %v1162_v38  ;;  %v2697_v36 = vadd.f32 %v2530_v0, %v1095_v19  ;;  %v622_v60 = vadd.f32 %v590_v62, %v522_v7  ;;  %v658_v56 = vmul.f32 %v2107_v14, %v2649_v16  ;;  %v449_v6 = vld [vmem:[#allocation2 + $0x1d0] sm:$0xff] }
  0xd2   : > { %v960_v51 = vadd.f32 %v928_v2, %v892_v27  ;;  %v793_v33 = vmul.f32 %v2165_v10, %v447_v8  ;;  %v523_v53 = vmul.f32 %v2101_v12, %v411_v35  ;;  %v591_v9 = vmul.f32 %v2104_v13, %v447_v8  ;;  %v485_v38 = vld [vmem:[#allocation2 + $0x1d1] sm:$0xff] }
  0xd3   : > { %v1812_v4 = vpack.c.bf16 %v2693_v55, %v2693_v55  ;;  %v1197_v11 = vmul.f32 0.70710677, %v2697_v36  ;;  %v1163_v20 = vmul.f32 0.5, %v2647_v29  ;;  %v861_v47 = vmul.f32 %v2170_v22, %v483_v39 }
  0xd4   : > { %v1028_v41 = vadd.f32 %v996_v34, %v960_v51  ;;  %v524_v28 = vmul.f32 %v2101_v12, %v412_v59  ;;  %v757_v52 = vadd.f32 %v725_v5, %v689_v21  ;;  %v592_v17 = vmul.f32 %v2104_v13, %v448_v42  ;;  %v414_v51 = vld [vmem:[#allocation2 + $0x1e7] sm:$0xff] }
  0xd5   : > { %v1955_v24 = vpop.eup %1954  ;;  %1451 = vst.msk [vmem:[%s2265_s8 + $0x50] sm:$0xf] %vm1430_vm1, %v1812_v4  ;;  %1958 = verf.f32 %v1197_v11  ;;  %v690_v8 = vadd.f32 %v658_v56, %v622_v60  ;;  %v659_v45 = vmul.f32 %v2107_v14, %v483_v39  ;;  %v929_v23 = vmul.f32 %v2173_v25, %v413_v50 }
  0xd6   : > { %v1259_v16 = vadd.f32 1.0, %v1955_v24  ;;  %v1096_v35 = vadd.f32 %v1064_v40, %v1028_v41  ;;  %v825_v3 = vadd.f32 %v793_v33, %v757_v52  ;;  %v623_v29 = vadd.f32 %v591_v9, %v523_v53 }
  0xd7   : > { %v726_v54 = vmul.f32 %v2110_v15, %v412_v59  ;;  %v997_v48 = vmul.f32 %v2180_v32, %v449_v6  ;;  %v624_v39 = vadd.f32 %v592_v17, %v524_v28  ;;  %v660_v37 = vmul.f32 %v2107_v14, %v484_v30 }
  0xd8   : > { %v2716_v58 = vmul.f32 %v1259_v16, %v1163_v20  ;;  %v2720_v31 = vadd.f32 %v2530_v0, %v1096_v35  ;;  %v893_v7 = vadd.f32 %v861_v47, %v825_v3  ;;  %v794_v44 = vmul.f32 %v2165_v10, %v448_v42  ;;  %v450_v42 = vld [vmem:[#allocation2 + $0x1e8] sm:$0xff] }
  0xd9   : > { %v1065_v49 = vmul.f32 %v2508_v18, %v485_v38  ;;  %v691_v59 = vadd.f32 %v659_v45, %v623_v29  ;;  %v862_v27 = vmul.f32 %v2170_v22, %v484_v30  ;;  %v758_v2 = vadd.f32 %v726_v54, %v690_v8  ;;  %v486_v16 = vld [vmem:[#allocation2 + $0x1e9] sm:$0xff] }
  0xda   : > { %v1813_v63 = vpack.c.bf16 %v2716_v58, %v2716_v58  ;;  %v1198_v62 = vmul.f32 0.70710677, %v2720_v31  ;;  %v961_v57 = vadd.f32 %v929_v23, %v893_v7  ;;  %v1164_v34 = vmul.f32 0.5, %v2673_v1 }
  0xdb   : > { %v692_v40 = vadd.f32 %v660_v37, %v624_v39  ;;  %v727_v4 = vmul.f32 %v2110_v15, %v413_v50  ;;  %v826_v60 = vadd.f32 %v794_v44, %v758_v2  ;;  %v930_v56 = vmul.f32 %v2173_v25, %v414_v51  ;;  %v415_v39 = vld [vmem:[#allocation2 + $0x1ef] sm:$0xff] }
  0xdc   : > { %v1957_v19 = vpop.eup %1956  ;;  %1452 = vst.msk [vmem:[%s2265_s8 + $0x54] sm:$0xf] %vm1430_vm1, %v1813_v63  ;;  %1960 = verf.f32 %v1198_v62  ;;  %v1029_v5 = vadd.f32 %v997_v48, %v961_v57  ;;  %v525_v53 = vmul.f32 %v2101_v12, %v413_v50  ;;  %v593_v30 = vmul.f32 %v2104_v13, %v449_v6 }
  0xdd   : > { %v1260_v21 = vadd.f32 1.0, %v1957_v19  ;;  %v526_v1 = vmul.f32 %v2101_v12, %v414_v51  ;;  %v594_v11 = vmul.f32 %v2104_v13, %v450_v42  ;;  %v894_v41 = vadd.f32 %v862_v27, %v826_v60 }
  0xde   : > { %v1097_v9 = vadd.f32 %v1065_v49, %v1029_v5  ;;  %v998_v24 = vmul.f32 %v2180_v32, %v450_v42  ;;  %v661_v47 = vmul.f32 %v2107_v14, %v485_v38  ;;  %v795_v28 = vmul.f32 %v2165_v10, %v449_v6 }
  0xdf   : > { %v2735_v33 = vmul.f32 %v1260_v21, %v1164_v34  ;;  %v1165_v17 = vmul.f32 0.5, %v2697_v36  ;;  %v962_v35 = vadd.f32 %v930_v56, %v894_v41  ;;  %v1066_v50 = vmul.f32 %v2508_v18, %v486_v16  ;;  %v451_v36 = vld [vmem:[#allocation2 + $0x1f0] sm:$0xff]  ;;  %v416_v21 = vld [vmem:[#allocation2 + $0x207] sm:$0xff] }
  0xe0   : > { %v1135_v52 = vadd.f32 %v2530_v0, %v1097_v9  ;;  %v759_v8 = vadd.f32 %v727_v4, %v691_v59  ;;  %v625_v3 = vadd.f32 %v593_v30, %v525_v53  ;;  %v863_v23 = vmul.f32 %v2170_v22, %v485_v38  ;;  %v487_v59 = vld [vmem:[#allocation2 + $0x1f1] sm:$0xff] }
  0xe1   : > { %v1814_v20 = vpack.c.bf16 %v2735_v33, %v2735_v33  ;;  %v728_v54 = vmul.f32 %v2110_v15, %v414_v51  ;;  %v626_v6 = vadd.f32 %v594_v11, %v526_v1  ;;  %v662_v48 = vmul.f32 %v2107_v14, %v486_v16 }
  0xe2   : > { %v1959_v45 = vpop.eup %1958  ;;  %v1199_v29 = vmul.f32 0.70710677, %v1135_v52  ;;  %v1030_v63 = vadd.f32 %v998_v24, %v962_v35  ;;  %v796_v37 = vmul.f32 %v2165_v10, %v450_v42  ;;  %v827_v44 = vadd.f32 %v795_v28, %v759_v8 }
  0xe3   : > { %1453 = vst.msk [vmem:[%s2265_s8 + $0x58] sm:$0xf] %vm1430_vm1, %v1814_v20  ;;  %v1261_v7 = vadd.f32 1.0, %v1959_v45  ;;  %v931_v62 = vmul.f32 %v2173_v25, %v415_v39  ;;  %v864_v38 = vmul.f32 %v2170_v22, %v486_v16  ;;  %v527_v19 = vmul.f32 %v2101_v12, %v415_v39 }
  0xe4   : > { %1962 = verf.f32 %v1199_v29  ;;  %v1098_v49 = vadd.f32 %v1066_v50, %v1030_v63  ;;  %v595_v27 = vmul.f32 %v2104_v13, %v451_v36  ;;  %v895_v2 = vadd.f32 %v863_v23, %v827_v44  ;;  %v452_v13 = vld [vmem:[#allocation2 + $0x208] sm:$0xff] }
  0xe5   : > { %v2756_v57 = vmul.f32 %v1261_v7, %v1165_v17  ;;  %v999_v34 = vmul.f32 %v2180_v32, %v451_v36  ;;  %v760_v5 = vadd.f32 %v728_v54, %v692_v40  ;;  %v1166_v42 = vmul.f32 0.5, %v2720_v31  ;;  %v453_v7 = vld [vmem:[#allocation2 + $0x210] sm:$0xff] }
  0xe6   : > { %v693_v4 = vadd.f32 %v661_v47, %v625_v3  ;;  %v2766_v60 = vadd.f32 %v2530_v0, %v1098_v49  ;;  %v729_v12 = vmul.f32 %v2110_v15, %v415_v39  ;;  %v963_v56 = vadd.f32 %v931_v62, %v895_v2  ;;  %v488_v47 = vld [vmem:[#allocation2 + $0x209] sm:$0xff] }
  0xe7   : > { %v1815_v51 = vpack.c.bf16 %v2756_v57, %v2756_v57  ;;  %v1067_v53 = vmul.f32 %v2508_v18, %v487_v59  ;;  %v828_v30 = vadd.f32 %v796_v37, %v760_v5  ;;  %v694_v40 = vadd.f32 %v662_v48, %v626_v6  ;;  %v417_v3 = vld [vmem:[#allocation2 + $0x20f] sm:$0xff] }
  0xe8   : > { %v1200_v1 = vmul.f32 0.70710677, %v2766_v60  ;;  %v663_v11 = vmul.f32 %v2107_v14, %v487_v59  ;;  %v932_v31 = vmul.f32 %v2173_v25, %v416_v21  ;;  %v627_v24 = vadd.f32 %v595_v27, %v527_v19 }
  0xe9   : > { %v1961_v9 = vpop.eup %1960  ;;  %1454 = vst.msk [vmem:[%s2265_s8 + $0x5c] sm:$0xf] %vm1430_vm1, %v1815_v51  ;;  %v1031_v20 = vadd.f32 %v999_v34, %v963_v56  ;;  %v896_v28 = vadd.f32 %v864_v38, %v828_v30  ;;  %v797_v16 = vmul.f32 %v2165_v10, %v451_v36  ;;  %v730_v17 = vmul.f32 %v2110_v15, %v416_v21  ;;  %v489_v36 = vld [vmem:[#allocation2 + $0x211] sm:$0xff]  ;;  %v418_v38 = vld [vmem:[#allocation2 + $0x227] sm:$0xff] }
  0xea   : > { %v1262_v41 = vadd.f32 1.0, %v1961_v9  ;;  %1964 = verf.f32 %v1200_v1  ;;  %v1000_v35 = vmul.f32 %v2180_v32, %v452_v13  ;;  %v761_v14 = vadd.f32 %v729_v12, %v693_v4  ;;  %v454_v51 = vld [vmem:[#allocation2 + $0x228] sm:$0xff] }
  0xeb   : > { %v1099_v8 = vadd.f32 %v1067_v53, %v1031_v20  ;;  %v964_v45 = vadd.f32 %v932_v31, %v896_v28  ;;  %v1167_v23 = vmul.f32 0.5, %v1135_v52  ;;  %v865_v29 = vmul.f32 %v2170_v22, %v487_v59  ;;  %v419_v56 = vld [vmem:[#allocation2 + $0x22f] sm:$0xff] }
  0xec   : > { %v2778_v50 = vmul.f32 %v1262_v41, %v1166_v42  ;;  %v1068_v54 = vmul.f32 %v2508_v18, %v488_v47  ;;  %v695_v48 = vadd.f32 %v663_v11, %v627_v24  ;;  %v798_v39 = vmul.f32 %v2165_v10, %v452_v13  ;;  %v490_v30 = vld [vmem:[#allocation2 + $0x229] sm:$0xff] }
  0xed   : > { %v2785_v63 = vadd.f32 %v2530_v0, %v1099_v8  ;;  %v1032_v37 = vadd.f32 %v1000_v35, %v964_v45  ;;  %v731_v44 = vmul.f32 %v2110_v15, %v417_v3  ;;  %v829_v62 = vadd.f32 %v797_v16, %v761_v14  ;;  %v455_v11 = vld [vmem:[#allocation2 + $0x230] sm:$0xff] }
  0xee   : > { %v1816_v6 = vpack.c.bf16 %v2778_v50, %v2778_v50  ;;  %v933_v52 = vmul.f32 %v2173_v25, %v417_v3  ;;  %v866_v19 = vmul.f32 %v2170_v22, %v488_v47  ;;  %v799_v59 = vmul.f32 %v2165_v10, %v453_v7  ;;  %v491_v35 = vld [vmem:[#allocation2 + $0x231] sm:$0xff] }
  0xef   : > { %v1201_v49 = vmul.f32 0.70710677, %v2785_v63  ;;  %v762_v27 = vadd.f32 %v730_v17, %v694_v40  ;;  %v1100_v34 = vadd.f32 %v1068_v54, %v1032_v37  ;;  %v867_v21 = vmul.f32 %v2170_v22, %v489_v36 }
  0xf0   : > { %1455 = vst.msk [vmem:[%s2265_s8 + $0x60] sm:$0xf] %vm1430_vm1, %v1816_v6  ;;  %v897_v5 = vadd.f32 %v865_v29, %v829_v62  ;;  %v1001_v15 = vmul.f32 %v2180_v32, %v453_v7  ;;  %v934_v12 = vmul.f32 %v2173_v25, %v418_v38  ;;  %v1069_v10 = vmul.f32 %v2508_v18, %v489_v36 }
  0xf1   : > { %v1963_v2 = vpop.eup %1962  ;;  %1966 = verf.f32 %v1201_v49  ;;  %v830_v4 = vadd.f32 %v798_v39, %v762_v27  ;;  %v1138_v53 = vadd.f32 %v2530_v0, %v1100_v34  ;;  %v763_v9 = vadd.f32 %v731_v44, %v695_v48 }
  0xf2   : > { %v1263_v42 = vadd.f32 1.0, %v1963_v2  ;;  %v965_v13 = vadd.f32 %v933_v52, %v897_v5  ;;  %v1002_v1 = vmul.f32 %v2180_v32, %v454_v51  ;;  %v935_v20 = vmul.f32 %v2173_v25, %v419_v56 }
  0xf3   : > { %v898_v22 = vadd.f32 %v866_v19, %v830_v4  ;;  %v1202_v31 = vmul.f32 0.70710677, %v1138_v53  ;;  %v831_v24 = vadd.f32 %v799_v59, %v763_v9  ;;  %v1070_v16 = vmul.f32 %v2508_v18, %v490_v30 }
  0xf4   : > { %v2800_v40 = vmul.f32 %v1263_v42, %v1167_v23  ;;  %v1033_v41 = vadd.f32 %v1001_v15, %v965_v13  ;;  %v1003_v45 = vmul.f32 %v2180_v32, %v455_v11  ;;  %v1168_v23 = vmul.f32 0.5, %v2766_v60 }
  0xf5   : > { %v966_v28 = vadd.f32 %v934_v12, %v898_v22  ;;  %1968 = verf.f32 %v1202_v31  ;;  %v899_v8 = vadd.f32 %v867_v21, %v831_v24  ;;  %v1071_v6 = vmul.f32 %v2508_v18, %v491_v35 }
  0xf6   : > { %v1817_v47 = vpack.c.bf16 %v2800_v40, %v2800_v40  ;;  %v1101_v17 = vadd.f32 %v1069_v10, %v1033_v41  ;;  %v1556_v48 = vmul.f32 %v2693_v55, %v2693_v55  ;;  %v1482_v60 = vsel %vm242_vm0, %v2693_v55, 0.0 }
  0xf7   : > { %v1965_v3 = vpop.eup %1964  ;;  %v1034_v14 = vadd.f32 %v1002_v1, %v966_v28  ;;  %v967_v54 = vadd.f32 %v935_v20, %v899_v8  ;;  %v1483_v49 = vadd.f32 %v1482_v60, %v2657_v61  ;;  %v1557_v19 = vmul.f32 %v2716_v58, %v2716_v58 }
  0xf8   : > { %1456 = vst.msk [vmem:[%s2265_s8 + $0x64] sm:$0xf] %vm1430_vm1, %v1817_v47  ;;  %v1264_v29 = vadd.f32 1.0, %v1965_v3  ;;  %v1139_v25 = vadd.f32 %v2530_v0, %v1101_v17  ;;  %v1587_v18 = vsel %vm242_vm0, %v1556_v48, 0.0  ;;  %v1558_v59 = vmul.f32 %v2735_v33, %v2735_v33 }
  0xf9   : > { %v1102_v7 = vadd.f32 %v1070_v16, %v1034_v14  ;;  %v1035_v32 = vadd.f32 %v1003_v45, %v967_v54  ;;  %v1169_v27 = vmul.f32 0.5, %v2785_v63  ;;  %v1588_v34 = vadd.f32 %v1587_v18, %v2667_v46 }
  0xfa   : > { %v1296_v39 = vmul.f32 %v1264_v29, %v1168_v23  ;;  %v1203_v36 = vmul.f32 0.70710677, %v1139_v25  ;;  %v1513_v61 = vsel %vm242_vm0, %v2716_v58, 0.0  ;;  %v1484_v5 = vsel %vm242_vm0, %v2735_v33, 0.0 }
  0xfb   : > { %v1140_v37 = vadd.f32 %v2530_v0, %v1102_v7  ;;  %v1103_v52 = vadd.f32 %v1071_v6, %v1035_v32  ;;  %v1514_v21 = vadd.f32 %v1513_v61, %v2680_v43  ;;  %v1618_v42 = vsel %vm242_vm0, %v1557_v19, 0.0 }
  0xfc   : > { %v1818_v44 = vpack.c.bf16 %v1296_v39, %v1296_v39  ;;  %1970 = verf.f32 %v1203_v36  ;;  %v1485_v63 = vadd.f32 %v1484_v5, %v1483_v49  ;;  %v1589_v4 = vsel %vm242_vm0, %v1558_v59, 0.0 }
  0xfd   : > { %v1204_v62 = vmul.f32 0.70710677, %v1140_v37  ;;  %v1141_v55 = vadd.f32 %v2530_v0, %v1103_v52  ;;  %v1170_v12 = vmul.f32 0.5, %v1138_v53  ;;  %v1559_v46 = vmul.f32 %v2756_v57, %v2756_v57 }
  0xfe   : > { %v1967_v38 = vpop.eup %1966  ;;  %1457 = vst.msk [vmem:[%s2265_s8 + $0x68] sm:$0xf] %vm1430_vm1, %v1818_v44  ;;  %v1560_v58 = vmul.f32 %v2778_v50, %v2778_v50  ;;  %v1619_v33 = vadd.f32 %v1618_v42, %v2689_v26  ;;  %v1590_v56 = vadd.f32 %v1589_v4, %v1588_v34  ;;  %v1515_v10 = vsel %vm242_vm0, %v2756_v57, 0.0 }
  0xff   : > { %v1265_v2 = vadd.f32 1.0, %v1967_v38  ;;  %1972 = verf.f32 %v1204_v62  ;;  %v1205_v51 = vmul.f32 0.70710677, %v1141_v55  ;;  %v1486_v30 = vsel %vm242_vm0, %v2778_v50, 0.0 }
 0x100   : > { %v1516_v53 = vadd.f32 %v1515_v10, %v1514_v21  ;;  %v1487_v9 = vadd.f32 %v1486_v30, %v1485_v63  ;;  %v1561_v22 = vmul.f32 %v2800_v40, %v2800_v40  ;;  %v1620_v11 = vsel %vm242_vm0, %v1559_v46, 0.0 }
 0x101   : > { %v1297_v15 = vmul.f32 %v1265_v2, %v1169_v27  ;;  %1974 = verf.f32 %v1205_v51  ;;  %v1591_v26 = vsel %vm242_vm0, %v1560_v58, 0.0  ;;  %v1562_v31 = vmul.f32 %v1296_v39, %v1296_v39 }
 0x102   : > { %v1969_v0 = vpop.eup %1968  ;;  %v1621_v41 = vadd.f32 %v1620_v11, %v1619_v33  ;;  %v1592_v24 = vadd.f32 %v1591_v26, %v1590_v56  ;;  %v1171_v20 = vmul.f32 0.5, %v1139_v25  ;;  %v1517_v50 = vsel %vm242_vm0, %v2800_v40, 0.0 }
 0x103   : > { %v1819_v43 = vpack.c.bf16 %v1297_v15, %v1297_v15  ;;  %v1266_v13 = vadd.f32 1.0, %v1969_v0  ;;  %v1488_v28 = vsel %vm242_vm0, %v1296_v39, 0.0  ;;  %v1518_v16 = vadd.f32 %v1517_v50, %v1516_v53 }
 0x104   : > { %v1622_v17 = vsel %vm242_vm0, %v1561_v22, 0.0  ;;  %v1489_v35 = vadd.f32 %v1488_v28, %v1487_v9  ;;  %v1593_v45 = vsel %vm242_vm0, %v1562_v31, 0.0  ;;  %v1563_v3 = vmul.f32 %v1297_v15, %v1297_v15 }
 0x105   : > { %1458 = vst.msk [vmem:[%s2265_s8 + $0x6c] sm:$0xf] %vm1430_vm1, %v1819_v43  ;;  %v1298_v1 = vmul.f32 %v1266_v13, %v1170_v12  ;;  %v1172_v23 = vmul.f32 0.5, %v1140_v37  ;;  %v1623_v25 = vadd.f32 %v1622_v17, %v1621_v41  ;;  %v1594_v54 = vadd.f32 %v1593_v45, %v1592_v24 }
 0x106   : > { %v1519_v40 = vsel %vm242_vm0, %v1297_v15, 0.0  ;;  %v1173_v44 = vmul.f32 0.5, %v1141_v55  ;;  %v1624_v60 = vsel %vm242_vm0, %v1563_v3, 0.0 }
 0x107   : > { %v1820_v57 = vpack.c.bf16 %v1298_v1, %v1298_v1  ;;  %v1564_v14 = vmul.f32 %v1298_v1, %v1298_v1  ;;  %v1490_v6 = vsel %vm242_vm0, %v1298_v1, 0.0  ;;  %v1520_v39 = vadd.f32 %v1519_v40, %v1518_v16 }
 0x108   : > { %v1491_v36 = vadd.f32 %v1490_v6, %v1489_v35  ;;  %v1625_v49 = vadd.f32 %v1624_v60, %v1623_v25 }
 0x109   : > { %v1971_v47 = vpop.eup %1970  ;;  %1459 = vst.msk [vmem:[%s2265_s8 + $0x70] sm:$0xf] %vm1430_vm1, %v1820_v57  ;;  %v1595_v62 = vsel %vm242_vm0, %v1564_v14, 0.0 }
 0x10a   : > { %v1267_v8 = vadd.f32 1.0, %v1971_v47  ;;  %v1596_v19 = vadd.f32 %v1595_v62, %v1594_v54 }
 0x10c   : > { %v1973_v29 = vpop.eup %1972  ;;  %v1299_v7 = vmul.f32 %v1267_v8, %v1171_v20 }
 0x10d   : > { %v1268_v48 = vadd.f32 1.0, %v1973_v29 }
 0x10e   : > { %v1821_v32 = vpack.c.bf16 %v1299_v7, %v1299_v7  ;;  %v1565_v37 = vmul.f32 %v1299_v7, %v1299_v7  ;;  %v1975_v38 = vpop.eup %1974  ;;  %v1521_v18 = vsel %vm242_vm0, %v1299_v7, 0.0 }
 0x10f   : > { %v1300_v52 = vmul.f32 %v1268_v48, %v1172_v23  ;;  %v1269_v55 = vadd.f32 1.0, %v1975_v38  ;;  %v1522_v34 = vadd.f32 %v1521_v18, %v1520_v39 }
 0x110   : > { %1460 = vst.msk [vmem:[%s2265_s8 + $0x74] sm:$0xf] %vm1430_vm1, %v1821_v32  ;;  %v1626_v21 = vsel %vm242_vm0, %v1565_v37, 0.0 }
 0x111   : > { %v1822_v59 = vpack.c.bf16 %v1300_v52, %v1300_v52  ;;  %v1492_v27 = vsel %vm242_vm0, %v1300_v52, 0.0  ;;  %v1566_v2 = vmul.f32 %v1300_v52, %v1300_v52  ;;  %v1301_v5 = vmul.f32 %v1269_v55, %v1173_v44 }
 0x112   : > { %v1493_v61 = vadd.f32 %v1492_v27, %v1491_v36  ;;  %v1627_v42 = vadd.f32 %v1626_v21, %v1625_v49 }
 0x113   : > { %1461 = vst.msk [vmem:[%s2265_s8 + $0x78] sm:$0xf] %vm1430_vm1, %v1822_v59  ;;  %v1597_v15 = vsel %vm242_vm0, %v1566_v2, 0.0  ;;  %v1823_v63 = vpack.c.bf16 %v1301_v5, %v1301_v5  ;;  %v1523_v4 = vsel %vm242_vm0, %v1301_v5, 0.0  ;;  %v1567_v12 = vmul.f32 %v1301_v5, %v1301_v5 }
 0x114   : > { %v1598_v51 = vadd.f32 %v1597_v15, %v1596_v19  ;;  %v1524_v0 = vadd.f32 %v1523_v4, %v1522_v34  ;;  %v1525_v46 = vsel %vm242_vm0, %v1493_v61, 0.0 }
 0x115   : > { %1462 = vst.msk [vmem:[%s2265_s8 + $0x7c] sm:$0xf] %vm1430_vm1, %v1823_v63  ;;  %v1628_v58 = vsel %vm242_vm0, %v1567_v12, 0.0 }
 0x116   : > { %v1526_v43 = vsel %vm242_vm0, %v1524_v0, 0.0  ;;  %v1629_v33 = vadd.f32 %v1628_v58, %v1627_v42  ;;  %v1630_v56 = vsel %vm242_vm0, %v1598_v51, 0.0 }
 0x117   : > { %v1527_v13 = vadd.f32 %v1526_v43, %v1525_v46 }
 0x118   : > { %v1631_v10 = vsel %vm242_vm0, %v1629_v33, 0.0 }
 0x119   : > { %v1528_v30 = vrot.slane %v1527_v13, 4  ;;  %v1632_v53 = vadd.f32 %v1631_v10, %v1630_v56 }
 0x11b   : > { %v1529_v9 = vadd.f32 %v1528_v30, %v1527_v13  ;;  %v1633_v22 = vrot.slane %v1632_v53, 4 }
 0x11d   : > { %v1530_v1 = vrot.slane %v1529_v9, 2  ;;  %v1634_v11 = vadd.f32 %v1633_v22, %v1632_v53 }
 0x11f   : > { %v1531_v26 = vadd.f32 %v1530_v1, %v1529_v9  ;;  %v1635_v31 = vrot.slane %v1634_v11, 2 }
 0x121   : > { %v1532_v41 = vrot.slane %v1531_v26, 1  ;;  %v1636_v24 = vadd.f32 %v1635_v31, %v1634_v11 }
 0x123   : > { %v1533_v57 = vadd.f32 %v1532_v41, %v1531_v26  ;;  %v1637_v20 = vrot.slane %v1636_v24, 1 }
 0x125   : > { %1535 = vst.msk [vmem:[%s238_s15] sm:$0x1] %vm1534_vm2, %v1533_v57  ;;  %v1638_v47 = vadd.f32 %v1637_v20, %v1636_v24 }
 0x127   : > { %1639 = vst.msk [vmem:[%s241_s20] sm:$0x1] %vm1534_vm2, %v1638_v47 }
 0x128 PF: > { %s16_s18 = sadd.s32 1, %s1984_s18  }
 0x129   : > { %p13_p4 = scmp.ge.s32.totalorder %s16_s18, 4  }
 0x12b   :  { %15 = sbr.rel (!%p13_p4) target bundleno = 1 (0x1), region = 88 }

</bundles_post_ra>
